<compile_context>
chip_gen: v7x
topology: tpu7x:2x2x1
jax: 0.10.0
libtpu: 0.0.40
codegen_flags: <defaults>
</compile_context>

<pallas_src>
import functools

import jax
import jax.numpy as jnp
import numpy as np
from jax.experimental import pallas as pl
from jax.experimental.pallas import tpu as pltpu


def upsample_block_kernel(x_ref, w_ref, mask_ref, o_ref, patches_ref,
                          *, K, H, W, Wp):
    # x_ref       : (Cin, Lin)         zero-padded input, flattened over Hp*Wp
    # w_ref       : (2*Cout, K*K*Cin)  fused conv+gates weights
    # mask_ref    : (1, L)             1.0 at valid spatial positions else 0.0
    # o_ref       : (Cout, L)          output (lane axis = flattened (H, Wp))
    # patches_ref : (K*K*Cin, L)       im2col scratch in VMEM
    Cin = x_ref.shape[0]
    Cout = o_ref.shape[0]
    L = o_ref.shape[-1]

    # im2col: row block (kh*K + kw)*Cin .. +Cin of `patches` is the input
    # shifted by (kh, kw) on the flattened (Hp*Wp) axis.  All offsets are
    # static Python ints, so these lower to plain (lane-shifted) VMEM copies.
    for kh in range(K):
        for kw in range(K):
            src = kh * Wp + kw
            dst = (kh * K + kw) * Cin
            patches_ref[dst:dst + Cin, :] = x_ref[:, src:src + L]

    # One fused matmul on the MXU:
    #   (2*Cout, K*K*Cin) @ (K*K*Cin, L) -> (2*Cout, L)   (f32 accumulation)
    acc = jnp.dot(w_ref[...], patches_ref[...],
                  preferred_element_type=jnp.float32)

    # InstanceNorm2d (affine=False, eps=1e-5), single-pass stats over the
    # H*W valid positions (mask removes width-padding / tail columns).
    mask = mask_ref[...]                                # (1, L), already f32
    inv_n = jnp.float32(1.0 / (H * W))
    masked = acc * mask
    s1 = jnp.sum(masked, axis=-1, keepdims=True)        # (2*Cout, 1)
    s2 = jnp.sum(acc * masked, axis=-1, keepdims=True)  # sum(acc^2 * mask)
    mean = s1 * inv_n
    var = jnp.maximum(s2 * inv_n - mean * mean, 0.0)
    norm = (acc - mean) * jax.lax.rsqrt(var + 1e-5)

    # GLU: inputs * sigmoid(gates)   (element-wise kept in f32; sigmoid -> EUP)
    o_ref[...] = (norm[:Cout, :] *
                  jax.nn.sigmoid(norm[Cout:, :])).astype(o_ref.dtype)


def upsample_block(x_nchw, w_conv_oihw, b_conv, w_gate_oihw, b_gate):
    """Forward pass matching the PyTorch UpSampleBlock (NCHW in / NCHW out).

    b_conv / b_gate are accepted for API parity but are mathematically
    cancelled by the affine=False InstanceNorm, so they are not used.
    """
    del b_conv, b_gate  # exactly cancelled by the mean subtraction in IN
    N, Cin, H, W = x_nchw.shape
    Cout, _, K, _ = w_conv_oihw.shape
    pad = (K - 1) // 2                       # stride=1, 'same' (padding=2, k=5)
    Hp, Wp = H + 2 * pad, W + 2 * pad

    # Lane-dense widths (multiples of 128).
    L = -(-(H * Wp) // 128) * 128                         # matmul/output width
    Lin = -(-((K - 1) * Wp + (K - 1) + L) // 128) * 128   # flat input length

    # --- wrapper glue: layout plumbing only --------------------------------
    x_pad = jnp.pad(x_nchw, ((0, 0), (0, 0), (pad, pad), (pad, pad)))
    x_flat = x_pad.reshape(N, Cin, Hp * Wp)
    x_flat = jnp.pad(x_flat, ((0, 0), (0, 0), (0, Lin - Hp * Wp)))

    # Fused weights: OIHW -> (Cout, K*K*Cin), contraction ordered (kh, kw, cin),
    # conv stacked on top of gates -> (2*Cout, K*K*Cin).
    def _flat(w):
        return jnp.transpose(w, (0, 2, 3, 1)).reshape(Cout, K * K * Cin)
    w_fused = jnp.concatenate([_flat(w_conv_oihw), _flat(w_gate_oihw)],
                              axis=0).astype(x_nchw.dtype)

    # Valid-position mask over the padded (H, Wp) grid, flattened to L lanes.
    p = np.arange(L)
    mask = jnp.asarray(((p < H * Wp) & ((p % Wp) < W)).astype(np.float32))
    mask = mask.reshape(1, L)

    kernel = functools.partial(upsample_block_kernel, K=K, H=H, W=W, Wp=Wp)

    out_wide = pl.pallas_call(
        kernel,
        out_shape=jax.ShapeDtypeStruct((N, Cout, L), x_nchw.dtype),
        grid_spec=pltpu.PrefetchScalarGridSpec(
            num_scalar_prefetch=0,
            grid=(N,),
            in_specs=[
                pl.BlockSpec((pl.Squeezed(), Cin, Lin), lambda n: (n, 0, 0)),
                # weights / mask: block index constant across the grid, so they
                # are DMA'd once and stay resident in VMEM.
                pl.BlockSpec((2 * Cout, K * K * Cin), lambda n: (0, 0)),
                pl.BlockSpec((1, L), lambda n: (0, 0)),
            ],
            out_specs=pl.BlockSpec((pl.Squeezed(), Cout, L),
                                   lambda n: (n, 0, 0)),
            scratch_shapes=[pltpu.VMEM((K * K * Cin, L), x_nchw.dtype)],
        ),
        compiler_params=pltpu.CompilerParams(
            dimension_semantics=("parallel",),
            vmem_limit_bytes=32 * 1024 * 1024),
    )(x_flat, w_fused, mask)

    # Drop width-padding / tail columns; output is already NCHW.
    # TODO(synk): for production H/W/C, tile the spatial axis with streamed
    # two-pass InstanceNorm stats so per-step VMEM stays within v7x's 64 MiB.
    return out_wide[:, :, :H * Wp].reshape(N, Cout, H, Wp)[:, :, :, :W]


def _reference(x_nchw, wc, bc, wg, bg):
    """Pure-JAX reference (NCHW, same math as the PyTorch module)."""
    def conv(x, w, b):
        y = jax.lax.conv_general_dilated(
            x, w, window_strides=(1, 1), padding='SAME',
            dimension_numbers=('NCHW', 'OIHW', 'NCHW'))
        return y + b.reshape(1, -1, 1, 1)

    def inorm(h, eps=1e-5):
        m = jnp.mean(h, axis=(2, 3), keepdims=True)
        v = jnp.mean((h - m) ** 2, axis=(2, 3), keepdims=True)
        return (h - m) / jnp.sqrt(v + eps)

    h1 = inorm(conv(x_nchw, wc, bc))
    hg = inorm(conv(x_nchw, wg, bg))
    return h1 * jax.nn.sigmoid(hg)


if __name__ == "__main__":
    N, Cin, Cout, H, W, K = 2, 4, 8, 16, 16, 5

    key = jax.random.PRNGKey(0)
    kx, kwc, kbc, kwg, kbg = jax.random.split(key, 5)

    x = jax.random.normal(kx, (N, Cin, H, W), dtype=jnp.float32)
    # deterministic synthetic parameters (shapes from nn.Conv2d(in, out, 5))
    scale = 1.0 / (Cin * K * K) ** 0.5
    w_conv = jax.random.uniform(kwc, (Cout, Cin, K, K), jnp.float32,
                                -scale, scale)
    b_conv = jax.random.uniform(kbc, (Cout,), jnp.float32, -scale, scale)
    w_gate = jax.random.uniform(kwg, (Cout, Cin, K, K), jnp.float32,
                                -scale, scale)
    b_gate = jax.random.uniform(kbg, (Cout,), jnp.float32, -scale, scale)

    out = upsample_block(x, w_conv, b_conv, w_gate, b_gate)
    out = jax.block_until_ready(out)

    ref = _reference(x, w_conv, b_conv, w_gate, b_gate)
    assert out.shape == (N, Cout, H, W)
    assert jnp.allclose(out, ref, atol=2e-4, rtol=2e-4), \
        float(jnp.max(jnp.abs(out - ref)))

    print("KERNEL_OK")
</pallas_src>

<mosaic_0001>
module attributes {stable_mosaic.version = 11 : i64} {
  func.func @upsample_block_kernel(%arg0: i32, %arg1: memref<1x4x512xf32, #tpu.memory_space<vmem>>, %arg2: memref<16x100xf32, #tpu.memory_space<vmem>>, %arg3: memref<1x384xf32, #tpu.memory_space<vmem>>, %arg4: memref<1x8x384xf32, #tpu.memory_space<vmem>>, %arg5: memref<100x384xf32, #tpu.memory_space<vmem>>) attributes {dimension_semantics = [#tpu.dimension_semantics<parallel>], iteration_bounds = array<i64: 2>, scalar_prefetch = 0 : i64, scratch_operands = 1 : i64, tpu.core_type = #tpu.core_type<tc>, window_params = [{transform_indices = @transform_0, window_bounds = array<i64: 1, 4, 512>}, {pipeline_mode = #tpu.pipeline_mode<synchronous>, transform_indices = @transform_1, window_bounds = array<i64: 16, 100>}, {pipeline_mode = #tpu.pipeline_mode<synchronous>, transform_indices = @transform_2, window_bounds = array<i64: 1, 384>}, {transform_indices = @transform_3, window_bounds = array<i64: 1, 8, 384>}]} {
    %c0 = arith.constant 0 : index
    %c0_0 = arith.constant 0 : index
    %c0_1 = arith.constant 0 : index
    %0 = vector.load %arg1[%c0, %c0_0, %c0_1] : memref<1x4x512xf32, #tpu.memory_space<vmem>>, vector<1x4x384xf32>
    %1 = vector.shape_cast %0 : vector<1x4x384xf32> to vector<4x384xf32>
    %c0_2 = arith.constant 0 : index
    %c0_3 = arith.constant 0 : index
    %2 = vector.load %arg5[%c0_2, %c0_3] : memref<100x384xf32, #tpu.memory_space<vmem>>, vector<4x384xf32>
    tpu.vector_store %arg5[%c0_2, %c0_3], %1 {strides = array<i32>} : memref<100x384xf32, #tpu.memory_space<vmem>>, vector<4x384xf32>,
    %c0_4 = arith.constant 0 : index
    %c0_5 = arith.constant 0 : index
    %c1 = arith.constant 1 : index
    %3 = vector.load %arg1[%c0_4, %c0_5, %c1] : memref<1x4x512xf32, #tpu.memory_space<vmem>>, vector<1x4x384xf32>
    %4 = vector.shape_cast %3 : vector<1x4x384xf32> to vector<4x384xf32>
    %c4 = arith.constant 4 : index
    %c0_6 = arith.constant 0 : index
    %5 = vector.load %arg5[%c4, %c0_6] : memref<100x384xf32, #tpu.memory_space<vmem>>, vector<4x384xf32>
    tpu.vector_store %arg5[%c4, %c0_6], %4 {strides = array<i32>} : memref<100x384xf32, #tpu.memory_space<vmem>>, vector<4x384xf32>,
    %c0_7 = arith.constant 0 : index
    %c0_8 = arith.constant 0 : index
    %c2 = arith.constant 2 : index
    %6 = vector.load %arg1[%c0_7, %c0_8, %c2] : memref<1x4x512xf32, #tpu.memory_space<vmem>>, vector<1x4x384xf32>
    %7 = vector.shape_cast %6 : vector<1x4x384xf32> to vector<4x384xf32>
    %c8 = arith.constant 8 : index
    %c0_9 = arith.constant 0 : index
    %8 = vector.load %arg5[%c8, %c0_9] : memref<100x384xf32, #tpu.memory_space<vmem>>, vector<4x384xf32>
    tpu.vector_store %arg5[%c8, %c0_9], %7 {strides = array<i32>} : memref<100x384xf32, #tpu.memory_space<vmem>>, vector<4x384xf32>,
    %c0_10 = arith.constant 0 : index
    %c0_11 = arith.constant 0 : index
    %c3 = arith.constant 3 : index
    %9 = vector.load %arg1[%c0_10, %c0_11, %c3] : memref<1x4x512xf32, #tpu.memory_space<vmem>>, vector<1x4x384xf32>
    %10 = vector.shape_cast %9 : vector<1x4x384xf32> to vector<4x384xf32>
    %c12 = arith.constant 12 : index
    %c0_12 = arith.constant 0 : index
    %11 = vector.load %arg5[%c12, %c0_12] : memref<100x384xf32, #tpu.memory_space<vmem>>, vector<4x384xf32>
    tpu.vector_store %arg5[%c12, %c0_12], %10 {strides = array<i32>} : memref<100x384xf32, #tpu.memory_space<vmem>>, vector<4x384xf32>,
    %c0_13 = arith.constant 0 : index
    %c0_14 = arith.constant 0 : index
    %c4_15 = arith.constant 4 : index
    %12 = vector.load %arg1[%c0_13, %c0_14, %c4_15] : memref<1x4x512xf32, #tpu.memory_space<vmem>>, vector<1x4x384xf32>
    %13 = vector.shape_cast %12 : vector<1x4x384xf32> to vector<4x384xf32>
    %c16 = arith.constant 16 : index
    %c0_16 = arith.constant 0 : index
    %14 = vector.load %arg5[%c16, %c0_16] : memref<100x384xf32, #tpu.memory_space<vmem>>, vector<4x384xf32>
    tpu.vector_store %arg5[%c16, %c0_16], %13 {strides = array<i32>} : memref<100x384xf32, #tpu.memory_space<vmem>>, vector<4x384xf32>,
    %c0_17 = arith.constant 0 : index
    %c0_18 = arith.constant 0 : index
    %c20 = arith.constant 20 : index
    %15 = vector.load %arg1[%c0_17, %c0_18, %c20] : memref<1x4x512xf32, #tpu.memory_space<vmem>>, vector<1x4x384xf32>
    %16 = vector.shape_cast %15 : vector<1x4x384xf32> to vector<4x384xf32>
    %c20_19 = arith.constant 20 : index
    %c0_20 = arith.constant 0 : index
    %17 = vector.load %arg5[%c20_19, %c0_20] : memref<100x384xf32, #tpu.memory_space<vmem>>, vector<4x384xf32>
    tpu.vector_store %arg5[%c20_19, %c0_20], %16 {strides = array<i32>} : memref<100x384xf32, #tpu.memory_space<vmem>>, vector<4x384xf32>,
    %c0_21 = arith.constant 0 : index
    %c0_22 = arith.constant 0 : index
    %c21 = arith.constant 21 : index
    %18 = vector.load %arg1[%c0_21, %c0_22, %c21] : memref<1x4x512xf32, #tpu.memory_space<vmem>>, vector<1x4x384xf32>
    %19 = vector.shape_cast %18 : vector<1x4x384xf32> to vector<4x384xf32>
    %c24 = arith.constant 24 : index
    %c0_23 = arith.constant 0 : index
    %20 = vector.load %arg5[%c24, %c0_23] : memref<100x384xf32, #tpu.memory_space<vmem>>, vector<4x384xf32>
    tpu.vector_store %arg5[%c24, %c0_23], %19 {strides = array<i32>} : memref<100x384xf32, #tpu.memory_space<vmem>>, vector<4x384xf32>,
    %c0_24 = arith.constant 0 : index
    %c0_25 = arith.constant 0 : index
    %c22 = arith.constant 22 : index
    %21 = vector.load %arg1[%c0_24, %c0_25, %c22] : memref<1x4x512xf32, #tpu.memory_space<vmem>>, vector<1x4x384xf32>
    %22 = vector.shape_cast %21 : vector<1x4x384xf32> to vector<4x384xf32>
    %c28 = arith.constant 28 : index
    %c0_26 = arith.constant 0 : index
    %23 = vector.load %arg5[%c28, %c0_26] : memref<100x384xf32, #tpu.memory_space<vmem>>, vector<4x384xf32>
    tpu.vector_store %arg5[%c28, %c0_26], %22 {strides = array<i32>} : memref<100x384xf32, #tpu.memory_space<vmem>>, vector<4x384xf32>,
    %c0_27 = arith.constant 0 : index
    %c0_28 = arith.constant 0 : index
    %c23 = arith.constant 23 : index
    %24 = vector.load %arg1[%c0_27, %c0_28, %c23] : memref<1x4x512xf32, #tpu.memory_space<vmem>>, vector<1x4x384xf32>
    %25 = vector.shape_cast %24 : vector<1x4x384xf32> to vector<4x384xf32>
    %c32 = arith.constant 32 : index
    %c0_29 = arith.constant 0 : index
    %26 = vector.load %arg5[%c32, %c0_29] : memref<100x384xf32, #tpu.memory_space<vmem>>, vector<4x384xf32>
    tpu.vector_store %arg5[%c32, %c0_29], %25 {strides = array<i32>} : memref<100x384xf32, #tpu.memory_space<vmem>>, vector<4x384xf32>,
    %c0_30 = arith.constant 0 : index
    %c0_31 = arith.constant 0 : index
    %c24_32 = arith.constant 24 : index
    %27 = vector.load %arg1[%c0_30, %c0_31, %c24_32] : memref<1x4x512xf32, #tpu.memory_space<vmem>>, vector<1x4x384xf32>
    %28 = vector.shape_cast %27 : vector<1x4x384xf32> to vector<4x384xf32>
    %c36 = arith.constant 36 : index
    %c0_33 = arith.constant 0 : index
    %29 = vector.load %arg5[%c36, %c0_33] : memref<100x384xf32, #tpu.memory_space<vmem>>, vector<4x384xf32>
    tpu.vector_store %arg5[%c36, %c0_33], %28 {strides = array<i32>} : memref<100x384xf32, #tpu.memory_space<vmem>>, vector<4x384xf32>,
    %c0_34 = arith.constant 0 : index
    %c0_35 = arith.constant 0 : index
    %c40 = arith.constant 40 : index
    %30 = vector.load %arg1[%c0_34, %c0_35, %c40] : memref<1x4x512xf32, #tpu.memory_space<vmem>>, vector<1x4x384xf32>
    %31 = vector.shape_cast %30 : vector<1x4x384xf32> to vector<4x384xf32>
    %c40_36 = arith.constant 40 : index
    %c0_37 = arith.constant 0 : index
    %32 = vector.load %arg5[%c40_36, %c0_37] : memref<100x384xf32, #tpu.memory_space<vmem>>, vector<4x384xf32>
    tpu.vector_store %arg5[%c40_36, %c0_37], %31 {strides = array<i32>} : memref<100x384xf32, #tpu.memory_space<vmem>>, vector<4x384xf32>,
    %c0_38 = arith.constant 0 : index
    %c0_39 = arith.constant 0 : index
    %c41 = arith.constant 41 : index
    %33 = vector.load %arg1[%c0_38, %c0_39, %c41] : memref<1x4x512xf32, #tpu.memory_space<vmem>>, vector<1x4x384xf32>
    %34 = vector.shape_cast %33 : vector<1x4x384xf32> to vector<4x384xf32>
    %c44 = arith.constant 44 : index
    %c0_40 = arith.constant 0 : index
    %35 = vector.load %arg5[%c44, %c0_40] : memref<100x384xf32, #tpu.memory_space<vmem>>, vector<4x384xf32>
    tpu.vector_store %arg5[%c44, %c0_40], %34 {strides = array<i32>} : memref<100x384xf32, #tpu.memory_space<vmem>>, vector<4x384xf32>,
    %c0_41 = arith.constant 0 : index
    %c0_42 = arith.constant 0 : index
    %c42 = arith.constant 42 : index
    %36 = vector.load %arg1[%c0_41, %c0_42, %c42] : memref<1x4x512xf32, #tpu.memory_space<vmem>>, vector<1x4x384xf32>
    %37 = vector.shape_cast %36 : vector<1x4x384xf32> to vector<4x384xf32>
    %c48 = arith.constant 48 : index
    %c0_43 = arith.constant 0 : index
    %38 = vector.load %arg5[%c48, %c0_43] : memref<100x384xf32, #tpu.memory_space<vmem>>, vector<4x384xf32>
    tpu.vector_store %arg5[%c48, %c0_43], %37 {strides = array<i32>} : memref<100x384xf32, #tpu.memory_space<vmem>>, vector<4x384xf32>,
    %c0_44 = arith.constant 0 : index
    %c0_45 = arith.constant 0 : index
    %c43 = arith.constant 43 : index
    %39 = vector.load %arg1[%c0_44, %c0_45, %c43] : memref<1x4x512xf32, #tpu.memory_space<vmem>>, vector<1x4x384xf32>
    %40 = vector.shape_cast %39 : vector<1x4x384xf32> to vector<4x384xf32>
    %c52 = arith.constant 52 : index
    %c0_46 = arith.constant 0 : index
    %41 = vector.load %arg5[%c52, %c0_46] : memref<100x384xf32, #tpu.memory_space<vmem>>, vector<4x384xf32>
    tpu.vector_store %arg5[%c52, %c0_46], %40 {strides = array<i32>} : memref<100x384xf32, #tpu.memory_space<vmem>>, vector<4x384xf32>,
    %c0_47 = arith.constant 0 : index
    %c0_48 = arith.constant 0 : index
    %c44_49 = arith.constant 44 : index
    %42 = vector.load %arg1[%c0_47, %c0_48, %c44_49] : memref<1x4x512xf32, #tpu.memory_space<vmem>>, vector<1x4x384xf32>
    %43 = vector.shape_cast %42 : vector<1x4x384xf32> to vector<4x384xf32>
    %c56 = arith.constant 56 : index
    %c0_50 = arith.constant 0 : index
    %44 = vector.load %arg5[%c56, %c0_50] : memref<100x384xf32, #tpu.memory_space<vmem>>, vector<4x384xf32>
    tpu.vector_store %arg5[%c56, %c0_50], %43 {strides = array<i32>} : memref<100x384xf32, #tpu.memory_space<vmem>>, vector<4x384xf32>,
    %c0_51 = arith.constant 0 : index
    %c0_52 = arith.constant 0 : index
    %c60 = arith.constant 60 : index
    %45 = vector.load %arg1[%c0_51, %c0_52, %c60] : memref<1x4x512xf32, #tpu.memory_space<vmem>>, vector<1x4x384xf32>
    %46 = vector.shape_cast %45 : vector<1x4x384xf32> to vector<4x384xf32>
    %c60_53 = arith.constant 60 : index
    %c0_54 = arith.constant 0 : index
    %47 = vector.load %arg5[%c60_53, %c0_54] : memref<100x384xf32, #tpu.memory_space<vmem>>, vector<4x384xf32>
    tpu.vector_store %arg5[%c60_53, %c0_54], %46 {strides = array<i32>} : memref<100x384xf32, #tpu.memory_space<vmem>>, vector<4x384xf32>,
    %c0_55 = arith.constant 0 : index
    %c0_56 = arith.constant 0 : index
    %c61 = arith.constant 61 : index
    %48 = vector.load %arg1[%c0_55, %c0_56, %c61] : memref<1x4x512xf32, #tpu.memory_space<vmem>>, vector<1x4x384xf32>
    %49 = vector.shape_cast %48 : vector<1x4x384xf32> to vector<4x384xf32>
    %c64 = arith.constant 64 : index
    %c0_57 = arith.constant 0 : index
    %50 = vector.load %arg5[%c64, %c0_57] : memref<100x384xf32, #tpu.memory_space<vmem>>, vector<4x384xf32>
    tpu.vector_store %arg5[%c64, %c0_57], %49 {strides = array<i32>} : memref<100x384xf32, #tpu.memory_space<vmem>>, vector<4x384xf32>,
    %c0_58 = arith.constant 0 : index
    %c0_59 = arith.constant 0 : index
    %c62 = arith.constant 62 : index
    %51 = vector.load %arg1[%c0_58, %c0_59, %c62] : memref<1x4x512xf32, #tpu.memory_space<vmem>>, vector<1x4x384xf32>
    %52 = vector.shape_cast %51 : vector<1x4x384xf32> to vector<4x384xf32>
    %c68 = arith.constant 68 : index
    %c0_60 = arith.constant 0 : index
    %53 = vector.load %arg5[%c68, %c0_60] : memref<100x384xf32, #tpu.memory_space<vmem>>, vector<4x384xf32>
    tpu.vector_store %arg5[%c68, %c0_60], %52 {strides = array<i32>} : memref<100x384xf32, #tpu.memory_space<vmem>>, vector<4x384xf32>,
    %c0_61 = arith.constant 0 : index
    %c0_62 = arith.constant 0 : index
    %c63 = arith.constant 63 : index
    %54 = vector.load %arg1[%c0_61, %c0_62, %c63] : memref<1x4x512xf32, #tpu.memory_space<vmem>>, vector<1x4x384xf32>
    %55 = vector.shape_cast %54 : vector<1x4x384xf32> to vector<4x384xf32>
    %c72 = arith.constant 72 : index
    %c0_63 = arith.constant 0 : index
    %56 = vector.load %arg5[%c72, %c0_63] : memref<100x384xf32, #tpu.memory_space<vmem>>, vector<4x384xf32>
    tpu.vector_store %arg5[%c72, %c0_63], %55 {strides = array<i32>} : memref<100x384xf32, #tpu.memory_space<vmem>>, vector<4x384xf32>,
    %c0_64 = arith.constant 0 : index
    %c0_65 = arith.constant 0 : index
    %c64_66 = arith.constant 64 : index
    %57 = vector.load %arg1[%c0_64, %c0_65, %c64_66] : memref<1x4x512xf32, #tpu.memory_space<vmem>>, vector<1x4x384xf32>
    %58 = vector.shape_cast %57 : vector<1x4x384xf32> to vector<4x384xf32>
    %c76 = arith.constant 76 : index
    %c0_67 = arith.constant 0 : index
    %59 = vector.load %arg5[%c76, %c0_67] : memref<100x384xf32, #tpu.memory_space<vmem>>, vector<4x384xf32>
    tpu.vector_store %arg5[%c76, %c0_67], %58 {strides = array<i32>} : memref<100x384xf32, #tpu.memory_space<vmem>>, vector<4x384xf32>,
    %c0_68 = arith.constant 0 : index
    %c0_69 = arith.constant 0 : index
    %c80 = arith.constant 80 : index
    %60 = vector.load %arg1[%c0_68, %c0_69, %c80] : memref<1x4x512xf32, #tpu.memory_space<vmem>>, vector<1x4x384xf32>
    %61 = vector.shape_cast %60 : vector<1x4x384xf32> to vector<4x384xf32>
    %c80_70 = arith.constant 80 : index
    %c0_71 = arith.constant 0 : index
    %62 = vector.load %arg5[%c80_70, %c0_71] : memref<100x384xf32, #tpu.memory_space<vmem>>, vector<4x384xf32>
    tpu.vector_store %arg5[%c80_70, %c0_71], %61 {strides = array<i32>} : memref<100x384xf32, #tpu.memory_space<vmem>>, vector<4x384xf32>,
    %c0_72 = arith.constant 0 : index
    %c0_73 = arith.constant 0 : index
    %c81 = arith.constant 81 : index
    %63 = vector.load %arg1[%c0_72, %c0_73, %c81] : memref<1x4x512xf32, #tpu.memory_space<vmem>>, vector<1x4x384xf32>
    %64 = vector.shape_cast %63 : vector<1x4x384xf32> to vector<4x384xf32>
    %c84 = arith.constant 84 : index
    %c0_74 = arith.constant 0 : index
    %65 = vector.load %arg5[%c84, %c0_74] : memref<100x384xf32, #tpu.memory_space<vmem>>, vector<4x384xf32>
    tpu.vector_store %arg5[%c84, %c0_74], %64 {strides = array<i32>} : memref<100x384xf32, #tpu.memory_space<vmem>>, vector<4x384xf32>,
    %c0_75 = arith.constant 0 : index
    %c0_76 = arith.constant 0 : index
    %c82 = arith.constant 82 : index
    %66 = vector.load %arg1[%c0_75, %c0_76, %c82] : memref<1x4x512xf32, #tpu.memory_space<vmem>>, vector<1x4x384xf32>
    %67 = vector.shape_cast %66 : vector<1x4x384xf32> to vector<4x384xf32>
    %c88 = arith.constant 88 : index
    %c0_77 = arith.constant 0 : index
    %68 = vector.load %arg5[%c88, %c0_77] : memref<100x384xf32, #tpu.memory_space<vmem>>, vector<4x384xf32>
    tpu.vector_store %arg5[%c88, %c0_77], %67 {strides = array<i32>} : memref<100x384xf32, #tpu.memory_space<vmem>>, vector<4x384xf32>,
    %c0_78 = arith.constant 0 : index
    %c0_79 = arith.constant 0 : index
    %c83 = arith.constant 83 : index
    %69 = vector.load %arg1[%c0_78, %c0_79, %c83] : memref<1x4x512xf32, #tpu.memory_space<vmem>>, vector<1x4x384xf32>
    %70 = vector.shape_cast %69 : vector<1x4x384xf32> to vector<4x384xf32>
    %c92 = arith.constant 92 : index
    %c0_80 = arith.constant 0 : index
    %71 = vector.load %arg5[%c92, %c0_80] : memref<100x384xf32, #tpu.memory_space<vmem>>, vector<4x384xf32>
    tpu.vector_store %arg5[%c92, %c0_80], %70 {strides = array<i32>} : memref<100x384xf32, #tpu.memory_space<vmem>>, vector<4x384xf32>,
    %c0_81 = arith.constant 0 : index
    %c0_82 = arith.constant 0 : index
    %c84_83 = arith.constant 84 : index
    %72 = vector.load %arg1[%c0_81, %c0_82, %c84_83] : memref<1x4x512xf32, #tpu.memory_space<vmem>>, vector<1x4x384xf32>
    %73 = vector.shape_cast %72 : vector<1x4x384xf32> to vector<4x384xf32>
    %c96 = arith.constant 96 : index
    %c0_84 = arith.constant 0 : index
    %74 = vector.load %arg5[%c96, %c0_84] : memref<100x384xf32, #tpu.memory_space<vmem>>, vector<4x384xf32>
    tpu.vector_store %arg5[%c96, %c0_84], %73 {strides = array<i32>} : memref<100x384xf32, #tpu.memory_space<vmem>>, vector<4x384xf32>,
    %c0_85 = arith.constant 0 : index
    %c0_86 = arith.constant 0 : index
    %75 = vector.load %arg2[%c0_85, %c0_86] : memref<16x100xf32, #tpu.memory_space<vmem>>, vector<16x100xf32>
    %c0_87 = arith.constant 0 : index
    %c0_88 = arith.constant 0 : index
    %76 = vector.load %arg5[%c0_87, %c0_88] : memref<100x384xf32, #tpu.memory_space<vmem>>, vector<100x384xf32>
    %cst = arith.constant dense<0.000000e+00> : vector<16x384xf32>
    %77 = tpu.matmul %75, %76, %cst {dimension_numbers = #tpu.dot_dimension_numbers<[1], [0], [0], [1], [0, 0, 1, 1], [], []>} : vector<16x100xf32>, vector<100x384xf32>, vector<16x384xf32> -> vector<16x384xf32>
    %c0_89 = arith.constant 0 : index
    %c0_90 = arith.constant 0 : index
    %78 = vector.load %arg3[%c0_89, %c0_90] : memref<1x384xf32, #tpu.memory_space<vmem>>, vector<1x384xf32>
    %79 = vector.broadcast %78 : vector<1x384xf32> to vector<16x384xf32>
    %80 = arith.mulf %77, %79 : vector<16x384xf32>
    %cst_91 = arith.constant dense<0.000000e+00> : vector<16xf32>
    %81 = vector.multi_reduction <add>, %80, %cst_91 [1] : vector<16x384xf32> to vector<16xf32>
    %82 = vector.shape_cast %81 : vector<16xf32> to vector<16x1xf32>
    %83 = arith.mulf %77, %80 : vector<16x384xf32>
    %cst_92 = arith.constant dense<0.000000e+00> : vector<16xf32>
    %84 = vector.multi_reduction <add>, %83, %cst_92 [1] : vector<16x384xf32> to vector<16xf32>
    %85 = vector.shape_cast %84 : vector<16xf32> to vector<16x1xf32>
    %cst_93 = arith.constant 3.906250e-03 : f32
    %86 = vector.broadcast %cst_93 : f32 to vector<16x1xf32>
    %87 = arith.mulf %82, %86 : vector<16x1xf32>
    %cst_94 = arith.constant 3.906250e-03 : f32
    %88 = vector.broadcast %cst_94 : f32 to vector<16x1xf32>
    %89 = arith.mulf %85, %88 : vector<16x1xf32>
    %90 = arith.mulf %87, %87 : vector<16x1xf32>
    %91 = arith.subf %89, %90 : vector<16x1xf32>
    %cst_95 = arith.constant 0.000000e+00 : f32
    %92 = vector.broadcast %cst_95 : f32 to vector<16x1xf32>
    %93 = arith.maximumf %91, %92 : vector<16x1xf32>
    %94 = vector.broadcast %87 : vector<16x1xf32> to vector<16x384xf32>
    %95 = arith.subf %77, %94 : vector<16x384xf32>
    %cst_96 = arith.constant 9.99999974E-6 : f32
    %96 = vector.broadcast %cst_96 : f32 to vector<16x1xf32>
    %97 = arith.addf %93, %96 : vector<16x1xf32>
    %98 = math.rsqrt %97 : vector<16x1xf32>
    %99 = vector.broadcast %98 : vector<16x1xf32> to vector<16x384xf32>
    %100 = arith.mulf %95, %99 : vector<16x384xf32>
    %101 = vector.extract_strided_slice %100 {offsets = [0, 0], sizes = [8, 384], strides = [1, 1]} : vector<16x384xf32> to vector<8x384xf32>
    %102 = vector.extract_strided_slice %100 {offsets = [8, 0], sizes = [8, 384], strides = [1, 1]} : vector<16x384xf32> to vector<8x384xf32>
    %103 = arith.negf %102 : vector<8x384xf32>
    %104 = math.exp %103 : vector<8x384xf32>
    %cst_97 = arith.constant 1.000000e+00 : f32
    %105 = vector.broadcast %cst_97 : f32 to vector<8x384xf32>
    %106 = arith.addf %105, %104 : vector<8x384xf32>
    %107 = arith.divf %105, %106 : vector<8x384xf32>
    %108 = arith.mulf %101, %107 : vector<8x384xf32>
    %c0_98 = arith.constant 0 : index
    %c0_99 = arith.constant 0 : index
    %c0_100 = arith.constant 0 : index
    %109 = vector.load %arg4[%c0_98, %c0_99, %c0_100] : memref<1x8x384xf32, #tpu.memory_space<vmem>>, vector<1x8x384xf32>
    %110 = vector.shape_cast %109 : vector<1x8x384xf32> to vector<8x384xf32>
    %111 = vector.shape_cast %108 : vector<8x384xf32> to vector<1x8x384xf32>
    tpu.vector_store %arg4[%c0_98, %c0_99, %c0_100], %111 {strides = array<i32>} : memref<1x8x384xf32, #tpu.memory_space<vmem>>, vector<1x8x384xf32>,
    return
  }
  func.func @transform_0(%arg0: i32) -> (i32, i32, i32) {
    %c0_i32 = arith.constant 0 : i32
    %c0_i32_0 = arith.constant 0 : i32
    %c0_i32_1 = arith.constant 0 : i32
    return %arg0, %c0_i32, %c0_i32_0 : i32, i32, i32
  }
  func.func @transform_1(%arg0: i32) -> (i32, i32) {
    %c0_i32 = arith.constant 0 : i32
    %c0_i32_0 = arith.constant 0 : i32
    %c0_i32_1 = arith.constant 0 : i32
    return %c0_i32, %c0_i32_0 : i32, i32
  }
  func.func @transform_2(%arg0: i32) -> (i32, i32) {
    %c0_i32 = arith.constant 0 : i32
    %c0_i32_0 = arith.constant 0 : i32
    %c0_i32_1 = arith.constant 0 : i32
    return %c0_i32, %c0_i32_0 : i32, i32
  }
  func.func @transform_3(%arg0: i32) -> (i32, i32, i32) {
    %c0_i32 = arith.constant 0 : i32
    %c0_i32_0 = arith.constant 0 : i32
    %c0_i32_1 = arith.constant 0 : i32
    return %arg0, %c0_i32, %c0_i32_0 : i32, i32, i32
  }
}

</mosaic_0001>

<bundles_post_ra>
// kernel: tpu_custom_call.1
= control target key start
LH: loop header
LB: loop body
LE: loop exit
PB: predicated region body
PF: predicated region fallthrough
CT: control target
= control target key end

     0   :  { %8 = vsyncpa [#allocation4], 0  ;;  %s2184_s0 = inlined_call_operand.hbm [shape: f32[2,4,512], index: 0, kind: input, shape index: {}]   ;;  %s2185_s1 = inlined_call_operand.hbm [shape: f32[16,100], index: 1, kind: input, shape index: {}]   ;;  %s2186_s2 = inlined_call_operand.vmem [shape: f32[1,384], index: 2, kind: input, shape index: {}]   ;;  %s2187_s3 = inlined_call_operand.hbm [shape: f32[2,8,384], index: 3, kind: output, shape index: {}]  }
   0x1   :  { %10 = vsyncpa [#allocation4 + $0x1], 0 }
   0x2   :  { %11 = vsyncpa [#allocation7], 0 }
   0x3   :  { %12 = vsyncpa [#allocation5], 0 }
   0x4   :  { %14 = vsyncpa [#allocation5 + $0x1], 0  ;;  %s1588_s12 = smov 0   ;;  %s1590_s13 = smov 0  }
   0x5   :  { %s1592_s14 = smov 0   ;;  %s1594_s15 = smov 0  }
   0x6 LB: > { %s1609_s16 = sadd.s32 4294967295, %s1536_s15   ;;  %s1186_s17 = sadd.s32 4294967294, %s1536_s15   ;;  %s1536_s15 = sphi %s1594_s15, %s2207_s15   ;;  %s1532_s14 = sphi %s1592_s14, %s2206_s14   ;;  %s1528_s13 = sphi %s1590_s13, %s2205_s13   ;;  %s1524_s12 = sphi %s1588_s12, %s2204_s12  }
   0x7   : > { %p40_p0 = scmp.ne.s32.totalorder %s1528_s13, %s1524_s12  ;;  %p2188_p1 = scmp.eq.s32.totalorder %s1609_s16, 0 }
   0x8   : > { %p112_p3 = scmp.eq.s32.totalorder %s1186_s17, 1  ;;  %p1187_p5 = scmp.ge.s32.totalorder %s1536_s15, 1 }
   0x9   : > { %p1618_p4 = por %p2188_p1, %p40_p0  ;;  %p119_p7 = scmp.lt.s32.totalorder %s1536_s15, 3 }
   0xa   : > { %p1623_p6 = por %p112_p3, %p40_p0  ;;  %s1538_s21 = smov [#allocation6]  }
   0xb   : > { %s2191_s18 = scalar_select %p1618_p4, 1, 0 }
   0xc   : > { %s2192_s19 = scalar_select %p1623_p6, 1, 0 }
   0xd   : > { %p1628_p8 = pnand %p1187_p5, %p119_p7  ;;  %s131_s22 = sshll.u32 %s1538_s21, 4  ;;  %s1632_s22 = int_to_ptr.vmem [resolvable:$true] %s131_s22 }
   0xe   : > { %s1644_s24 = sadd.s32 1, %s1536_s15   ;;  %s27_s25 = sadd.s32 1, %s1532_s14 }
   0xf   : > { %s2193_s20 = scalar_select %p1628_p8, 1, 0 }
  0x10   : > { %p1312_p9 = pneg %p1628_p8  ;;  %s24_s26 = ssub.s32 %s1536_s15, %s1644_s24 }
  0x11   : > { %s1408_s29 = scalar_lea.hbm %s2185_s1, 256 }
  0x12   : > { %p1639_p11 = pnand %p1312_p9, %p2188_p1  ;;  %p1409_p12 = scmp.ne.s32.totalorder %s2185_s1, %s1408_s29 }
  0x13   : > { %p1415_p5 = scmp.lt.u32.totalorder %s1408_s29, %s2185_s1 }
  0x14   : > { %p1410_p13 = pneg %p1639_p11 }
  0x16   : > { %p1411_p0 = pnand %p1410_p13, %p1409_p12 }
  0x18   : > { %p1412_p3 = pneg %p1411_p0 }
  0x1a   : > { %p1417_p7 = pnand %p1415_p5, %p1412_p3 }
  0x1c   : > { %1420 = shalt.err (!%p1417_p7)
}
  0x1d   : > { %s1421_s7 = scalar_lea.vmem %s1632_s22, 256  ;;  %p1429_p2 = scmp.lt.s32.totalorder %s1632_s22, %s1632_s22 }
  0x1e   : > { %p1422_p9 = scmp.ne.s32.totalorder %s1632_s22, %s1421_s7  ;;  %p1430_p6 = scmp.lt.s32.totalorder %s1421_s7, %s1421_s7 }
  0x20   : > { %p1424_p10 = pnand %p1422_p9, %p1410_p13  ;;  %p1431_p4 = por %p1430_p6, %p1429_p2 }
  0x22   : > { %p1425_p1 = pneg %p1424_p10 }
  0x24   : > { %p1432_p8 = pnand %p1431_p4, %p1425_p1 }
  0x26   : > { %1435 = shalt.err (!%p1432_p8)
}
  0x27   : > { %s1539_s8 = smov 128   ;;  %s1540_s9 = smov 8  }
  0x28   : > { %1315 = dma.hbm_to_vmem [thread:$0]  (!%p1639_p11), %s2185_s1, 256, %s1632_s22, [#allocation7], %s1539_s8, %s1539_s8, %s1540_s9  }
  0x29   : > { %p25_p2 = scmp.eq.s32.totalorder %s24_s26, 0  ;;  %p34_p1 = scmp.ne.s32.totalorder %s1532_s14, %s1528_s13 }
  0x2a   : > { %p35_p4 = scmp.eq.s32.totalorder %s1536_s15, 0  ;;  %p1325_p6 = scmp.lt.s32.totalorder %s1536_s15, 2 }
  0x2b   : > { %s1675_s17 = scalar_select %p25_p2, %s1532_s14, %s27_s25  }
  0x2c   : > { %p36_p8 = por %p35_p4, %p34_p1  ;;  %p2195_p10 = scmp.eq.s32.totalorder %s1609_s16, 1 }
  0x2d   : > { %s148_s27 = sand.u32 1, %s1532_s14   ;;  %s1209_s28 = sshll.u32 %s1536_s15, 8 }
  0x2e   : > { %p1679_p12 = por %p2195_p10, %p34_p1  ;;  %s1190_s29 = sshll.u32 %s148_s27, 4 }
  0x2f   : > { %s1688_s4 = scalar_lea.hbm %s2184_s0, %s1209_s28  ;;  %s152_s22 = scalar_lea.vmem [#allocation3], %s1190_s29 }
  0x30   : > { %s160_s25 = sshll.u32 %s152_s22, 4  ;;  %p1690_p11 = pnand %p1325_p6, %p36_p8  ;;  %s1694_s25 = int_to_ptr.vmem [resolvable:$true] %s160_s25 }
  0x31   : > { %s149_s5 = scalar_lea.sflag [#allocation4], %s148_s27  ;;  %s1436_s6 = scalar_lea.hbm %s1688_s4, 256 }
  0x32   : > { %p1437_p13 = scmp.ne.s32.totalorder %s1688_s4, %s1436_s6  ;;  %p1438_p0 = pneg %p1690_p11 }
  0x33   : > { %s1441_s9 = scalar_lea.hbm %s2184_s0, 512  ;;  %p1442_p7 = scmp.lt.u32.totalorder %s1688_s4, %s2184_s0 }
  0x34   : > { %p1439_p3 = pnand %p1438_p0, %p1437_p13  ;;  %p1443_p9 = scmp.lt.u32.totalorder %s1441_s9, %s1436_s6 }
  0x35   : > { %p1445_p1 = scmp.lt.u32.totalorder %s1436_s6, %s1688_s4 }
  0x36   : > { %p1440_p5 = pneg %p1439_p3  ;;  %p1444_p2 = por %p1443_p9, %p1442_p7 }
  0x38   : > { %p1446_p4 = por %p1445_p1, %p1444_p2 }
  0x3a   : > { %p1447_p6 = pnand %p1446_p4, %p1440_p5 }
  0x3c   : > { %1450 = shalt.err (!%p1447_p6)
}
  0x3d   : > { %s1451_s27 = scalar_lea.vmem %s1694_s25, 256  ;;  %s1541_s28 = smov [#allocation3]  }
  0x3e   : > { %p1452_p8 = scmp.ne.s32.totalorder %s1694_s25, %s1451_s27  ;;  %s1456_s29 = sshll.u32 %s1541_s28, 4  ;;  %s1457_s29 = int_to_ptr.vmem [resolvable:$false] %s1456_s29 }
  0x3f   : > { %s1458_s23 = scalar_lea.vmem %s1457_s29, 512  ;;  %p1459_p3 = scmp.lt.s32.totalorder %s1694_s25, %s1457_s29 }
  0x40   : > { %p1454_p10 = pnand %p1452_p8, %p1438_p0  ;;  %p1460_p7 = scmp.lt.s32.totalorder %s1458_s23, %s1451_s27 }
  0x42   : > { %p1455_p13 = pneg %p1454_p10  ;;  %p1461_p9 = por %p1460_p7, %p1459_p3 }
  0x44   : > { %p1462_p2 = pnand %p1461_p9, %p1455_p13 }
  0x46   : > { %1465 = shalt.err (!%p1462_p2)
}
  0x47   : > { %1319 = dma.hbm_to_vmem [thread:$0]  (!%p1690_p11), %s1688_s4, 256, %s1694_s25, %s149_s5  }
  0x48   : > { %p2198_p5 = scmp.ne.s32.totalorder %s2193_s20, 0 }
  0x49   : > { %s1724_s30 = sand.u32 (!%p2198_p5), 1, %s1528_s13   ;;  %p2199_p0 = scmp.ne.s32.totalorder (!%p2198_p5), %s2191_s18, 0 }
  0x4a   : > { %169 = sbr.rel (%p2198_p5) target bundleno = 831 (0x33f), region = 32  ;;  %s1194_s22 = sshll.u32 (!%p2198_p5), %s1724_s30, 4 }
  0x4b   : > { %s172_s6 = scalar_lea.sflag (!%p2198_p5), [#allocation4], %s1724_s30  ;;  %s1728_s7 = scalar_lea.vmem (!%p2198_p5), [#allocation3], %s1194_s22 }
  0x51   : > { %1511 = dma.done.wait (%p2199_p0), %s172_s6, 256  }
  0x52   : > { %1513 = vsyncadd (%p2199_p0), %s172_s6, 4294967040  ;;  %p2200_p11 = scmp.eq.s32.totalorder %s1609_s16, 0 }
  0x54   : > { %1515 = dma.done.wait (%p2200_p11), [#allocation7], 256   ;;  %p2201_p1 = pmov %p2200_p11 }
  0x55   : > { %v1739_v0 = vld [vmem:[%s1728_s7 + $0x8] sm:$0xff]  ;;  %v1742_v1 = vld [vmem:[%s1728_s7] sm:$0xff]  ;;  %s1542_s20 = smov 126   ;;  %s1543_s4 = smov 127   ;;  %vm248_vm0 = vcmask 1031168   ;;  %vm272_vm1 = vcmask 1022976  }
  0x56   : > { %1517 = vsyncadd (%p2201_p1), [#allocation7], 4294967040  ;;  %244 = vrot.lane.b32.xlu1 %v1739_v0, %s1542_s20  ;;  %218 = vrot.lane.b32.xlu0 %v1742_v1, %s1543_s4  ;;  %v1750_v2 = vcombine.high %v1742_v1, %v1742_v1  ;;  %207 = vst [vmem:[#allocation2] sm:$0xf] %v1742_v1  ;;  %s1544_s18 = smov 125   ;;  %v1759_v3 = vcombine.low %v1739_v0, %v1739_v0  ;;  %s1545_s25 = smov 124  }
  0x57   : > { %v1763_v4 = vcombine.low %v1742_v1, %v1742_v1  ;;  %s1546_s26 = smov 108   ;;  %s1547_s5 = smov 107   ;;  %v203_v5 = vld [vmem:[%s1728_s7 + $0x8] sm:$0xf]  ;;  %v1798_v6 = vcombine.high %v1739_v0, %v1739_v0  ;;  %vm224_vm2 = vcmask 1039360   ;;  %vm296_vm3 = vcmask 1014784  }
  0x58   : > { %208 = vst [vmem:[#allocation2 + $0x8] sm:$0xf] %v1750_v2  ;;  %s1548_s8 = smov 106   ;;  %209 = vst [vmem:[#allocation2 + $0x10] sm:$0xf] %v203_v5  ;;  %s1549_s9 = smov 105  }
  0x59   : > { %s1550_s10 = smov 104   ;;  %s1551_s11 = smov 88   ;;  %vm320_vm4 = vcmask 883712   ;;  %vm344_vm5 = vcmask 875520   ;;  %vm368_vm6 = vcmask 867328   ;;  %vm392_vm7 = vcmask 859136  }
  0x5a   : > { %242 = vrot.lane.b32.xlu1 %v1750_v2, %s1542_s20  ;;  %266 = vrot.lane.b32.xlu0 %v1742_v1, %s1544_s18  ;;  %s1552_s27 = smov 87   ;;  %s1553_s28 = smov 86   ;;  %vm416_vm8 = vcmask 850944   ;;  %vm440_vm9 = vcmask 719872   ;;  %vm464_vm10 = vcmask 711680   ;;  %vm827_vm11 = vcmask 818176  }
  0x5b   : > { %s1554_s29 = smov 85   ;;  %s1555_s23 = smov 84   ;;  %vm488_vm12 = vcmask 703488   ;;  %vm512_vm13 = vcmask 695296   ;;  %vm536_vm14 = vcmask 687104   ;;  %vm560_vm15 = vcmask 556032  }
  0x5c   : > { %s1556_s22 = smov 68   ;;  %s1557_s6 = smov 67  }
  0x5d   : > { %s1558_s7 = smov 66  }
  0x5e   : > { %268 = vrot.lane.b32.xlu1 %v1759_v3, %s1544_s18  ;;  %220 = vrot.lane.b32.xlu0 %v1759_v3, %s1543_s4 }
  0x62   : > { %240 = vrot.lane.b32.xlu1 %v1742_v1, %s1542_s20  ;;  %216 = vrot.lane.b32.xlu0 %v1763_v4, %s1543_s4 }
  0x66   : > { %290 = vrot.lane.b32.xlu1 %v1750_v2, %s1545_s25  ;;  %264 = vrot.lane.b32.xlu0 %v1763_v4, %s1544_s18 }
  0x6a   : > { %314 = vrot.lane.b32.xlu1 %v1742_v1, %s1546_s26  ;;  %292 = vrot.lane.b32.xlu0 %v1739_v0, %s1545_s25 }
  0x6e   : > { %338 = vrot.lane.b32.xlu1 %v1750_v2, %s1547_s5  ;;  %316 = vrot.lane.b32.xlu0 %v1759_v3, %s1546_s26 }
  0x72   : > { %362 = vrot.lane.b32.xlu1 %v1742_v1, %s1548_s8  ;;  %340 = vrot.lane.b32.xlu0 %v1739_v0, %s1547_s5 }
  0x76   : > { %288 = vrot.lane.b32.xlu1 %v1742_v1, %s1545_s25  ;;  %364 = vrot.lane.b32.xlu0 %v1759_v3, %s1548_s8 }
  0x7a   : > { %336 = vrot.lane.b32.xlu1 %v1742_v1, %s1547_s5  ;;  %312 = vrot.lane.b32.xlu0 %v1763_v4, %s1546_s26 }
  0x7e   : > { %222 = vrot.lane.b32.xlu1 %v1739_v0, %s1543_s4  ;;  %360 = vrot.lane.b32.xlu0 %v1763_v4, %s1548_s8  ;;  %s1560_s4 = smov 64  }
  0x82   : > { %270 = vrot.lane.b32.xlu1 %v1739_v0, %s1544_s18  ;;  %246 = vrot.lane.b32.xlu0 %v1798_v6, %s1542_s20  ;;  %s1559_s20 = smov 65   ;;  %s1561_s18 = smov 48  }
  0x86   : > { %388 = vrot.lane.b32.xlu1 %v1739_v0, %s1549_s9  ;;  %386 = vrot.lane.b32.xlu0 %v1750_v2, %s1549_s9 }
  0x8a   : > { %412 = vrot.lane.b32.xlu1 %v1759_v3, %s1550_s10  ;;  %410 = vrot.lane.b32.xlu0 %v1742_v1, %s1550_s10 }
  0x8e   : > { %436 = vrot.lane.b32.xlu1 %v1739_v0, %s1551_s11  ;;  %434 = vrot.lane.b32.xlu0 %v1750_v2, %s1551_s11 }
  0x92   : > { %460 = vrot.lane.b32.xlu1 %v1759_v3, %s1552_s27  ;;  %458 = vrot.lane.b32.xlu0 %v1742_v1, %s1552_s27 }
  0x96   : > { %408 = vrot.lane.b32.xlu1 %v1763_v4, %s1550_s10  ;;  %384 = vrot.lane.b32.xlu0 %v1742_v1, %s1549_s9 }
  0x9a   : > { %456 = vrot.lane.b32.xlu1 %v1763_v4, %s1552_s27  ;;  %432 = vrot.lane.b32.xlu0 %v1742_v1, %s1551_s11 }
  0x9e   : > { %318 = vrot.lane.b32.xlu1 %v1739_v0, %s1546_s26  ;;  %294 = vrot.lane.b32.xlu0 %v1798_v6, %s1545_s25  ;;  %s1562_s25 = smov 47   ;;  %s1563_s26 = smov 46  }
  0xa2   : > { %366 = vrot.lane.b32.xlu1 %v1739_v0, %s1548_s8  ;;  %342 = vrot.lane.b32.xlu0 %v1798_v6, %s1547_s5  ;;  %s1564_s5 = smov 45   ;;  %s1565_s8 = smov 44  }
  0xa6   : > { %484 = vrot.lane.b32.xlu1 %v1739_v0, %s1553_s28  ;;  %482 = vrot.lane.b32.xlu0 %v1750_v2, %s1553_s28 }
  0xaa   : > { %508 = vrot.lane.b32.xlu1 %v1759_v3, %s1554_s29  ;;  %506 = vrot.lane.b32.xlu0 %v1742_v1, %s1554_s29 }
  0xae   : > { %532 = vrot.lane.b32.xlu1 %v1739_v0, %s1555_s23  ;;  %530 = vrot.lane.b32.xlu0 %v1750_v2, %s1555_s23 }
  0xb2   : > { %556 = vrot.lane.b32.xlu1 %v1759_v3, %s1556_s22  ;;  %554 = vrot.lane.b32.xlu0 %v1742_v1, %s1556_s22 }
  0xb6   : > { %504 = vrot.lane.b32.xlu1 %v1763_v4, %s1554_s29  ;;  %480 = vrot.lane.b32.xlu0 %v1742_v1, %s1553_s28 }
  0xba   : > { %552 = vrot.lane.b32.xlu1 %v1763_v4, %s1556_s22  ;;  %528 = vrot.lane.b32.xlu0 %v1742_v1, %s1555_s23 }
  0xbe   : > { %414 = vrot.lane.b32.xlu1 %v1739_v0, %s1550_s10  ;;  %390 = vrot.lane.b32.xlu0 %v1798_v6, %s1549_s9 }
  0xc2   : > { %462 = vrot.lane.b32.xlu1 %v1739_v0, %s1552_s27  ;;  %438 = vrot.lane.b32.xlu0 %v1798_v6, %s1551_s11  ;;  %s1302_s11 = smul.u32 24, %s1724_s30 }
  0xc3   : > { %s1303_s27 = smul.u32 384, %s1609_s16  ;;  %s1092_s16 = scalar_lea.sflag [#allocation5], %s1724_s30 }
  0xc6   : > { %580 = vrot.lane.b32.xlu1 %v1739_v0, %s1557_s6  ;;  %578 = vrot.lane.b32.xlu0 %v1750_v2, %s1557_s6 }
  0xc8   : > { %v1871_v7 = vpop.permute.xlu1 %244  ;;  %v219_v8 = vpop.permute.xlu0 %218 }
  0xca   : > { %604 = vrot.lane.b32.xlu1 %v1759_v3, %s1558_s7  ;;  %602 = vrot.lane.b32.xlu0 %v1742_v1, %s1558_s7 }
  0xcc   : > { %v243_v9 = vpop.permute.xlu1 %242  ;;  %v267_v10 = vpop.permute.xlu0 %266 }
  0xcd   : > { %v250_v11 = vsel %vm248_vm0, %v243_v9, %v1871_v7 }
  0xce   : > { %256 = vst [vmem:[#allocation2 + $0x20] sm:$0xf] %v250_v11  ;;  %628 = vrot.lane.b32.xlu1 %v1739_v0, %s1559_s20  ;;  %626 = vrot.lane.b32.xlu0 %v1750_v2, %s1559_s20 }
  0xd0   : > { %v1883_v12 = vpop.permute.xlu1 %268  ;;  %v1885_v13 = vpop.permute.xlu0 %220 }
  0xd1   : > { %v274_v14 = vsel %vm272_vm1, %v267_v10, %v1883_v12  ;;  %v226_v15 = vsel %vm224_vm2, %v219_v8, %v1885_v13 }
  0xd2   : > { %280 = vst [vmem:[#allocation2 + $0x20] sm:$0xf0] %v274_v14  ;;  %232 = vst [vmem:[#allocation2 + $0x8] sm:$0xf0] %v226_v15  ;;  %652 = vrot.lane.b32.xlu1 %v1759_v3, %s1560_s4  ;;  %650 = vrot.lane.b32.xlu0 %v1742_v1, %s1560_s4 }
  0xd4   : > { %v241_v16 = vpop.permute.xlu1 %240  ;;  %v217_v17 = vpop.permute.xlu0 %216 }
  0xd5   : > { %v249_v18 = vsel %vm248_vm0, %v241_v16, %v243_v9  ;;  %v225_v19 = vsel %vm224_vm2, %v217_v17, %v219_v8 }
  0xd6   : > { %255 = vst [vmem:[#allocation2 + $0x18] sm:$0xf] %v249_v18  ;;  %231 = vst [vmem:[#allocation2] sm:$0xf0] %v225_v19  ;;  %600 = vrot.lane.b32.xlu1 %v1763_v4, %s1558_s7  ;;  %576 = vrot.lane.b32.xlu0 %v1742_v1, %s1557_s6 }
  0xd8   : > { %v291_v20 = vpop.permute.xlu1 %290  ;;  %v265_v21 = vpop.permute.xlu0 %264 }
  0xd9   : > { %v273_v22 = vsel %vm272_vm1, %v265_v21, %v267_v10  ;;  %v789_v23 = vld [vmem:[#allocation2 + $0x8] sm:$0xff]  ;;  %v792_v24 = vld [vmem:[#allocation2 + $0x20] sm:$0xff] }
  0xda   : > { %279 = vst [vmem:[#allocation2 + $0x18] sm:$0xf0] %v273_v22  ;;  %648 = vrot.lane.b32.xlu1 %v1763_v4, %s1560_s4  ;;  %624 = vrot.lane.b32.xlu0 %v1742_v1, %s1559_s20  ;;  %v1254_v25 = vpack.c.bf16 %v792_v24, %v789_v23 }
  0xdc   : > { %v315_v26 = vpop.permute.xlu1 %314  ;;  %v1906_v27 = vpop.permute.xlu0 %292  ;;  %1255 = vmatprep.subr.bf16.mxu0 %v1254_v25  ;;  %v2004_v25 = vld [vmem:[#allocation6] sm:$0xff] }
  0xdd   : > { %v298_v28 = vsel %vm296_vm3, %v291_v20, %v1906_v27  ;;  %v788_v32 = vld [vmem:[#allocation2] sm:$0xff]  ;;  %1251 = vmatprep.mubr.msk.f32.mxu1 %vm827_vm11, %v2004_v25 }
  0xde   : > { %304 = vst [vmem:[#allocation2 + $0x38] sm:$0xf] %v298_v28  ;;  %510 = vrot.lane.b32.xlu1 %v1739_v0, %s1554_s29  ;;  %486 = vrot.lane.b32.xlu0 %v1798_v6, %s1553_s28  ;;  %s201_s28 = scalar_lea.vmem [#allocation8], %s1302_s11 }
  0xdf   : > { %s1106_s29 = sshll.u32 %s201_s28, 4  ;;  %s2142_s29 = int_to_ptr.vmem [resolvable:$true] %s1106_s29 }
  0xe0   : > { %v339_v29 = vpop.permute.xlu1 %338  ;;  %v1914_v30 = vpop.permute.xlu0 %316 }
  0xe1   : > { %v322_v31 = vsel %vm320_vm4, %v315_v26, %v1914_v30  ;;  %v791_v33 = vld [vmem:[#allocation2 + $0x18] sm:$0xff] }
  0xe2   : > { %328 = vst [vmem:[#allocation2 + $0x38] sm:$0xf0] %v322_v31  ;;  %558 = vrot.lane.b32.xlu1 %v1739_v0, %s1556_s22  ;;  %534 = vrot.lane.b32.xlu0 %v1798_v6, %s1555_s23  ;;  %v1256_v34 = vpack.c.bf16 %v791_v33, %v788_v32 }
  0xe4   : > { %v363_v35 = vpop.permute.xlu1 %362  ;;  %v1922_v36 = vpop.permute.xlu0 %340  ;;  %1257 = vmatpush1.bf16.msra.mxu0 %v1256_v34 }
  0xe5   : > { %v346_v37 = vsel %vm344_vm5, %v339_v29, %v1922_v36 }
  0xe6   : > { %352 = vst [vmem:[#allocation2 + $0x50] sm:$0xf] %v346_v37  ;;  %676 = vrot.lane.b32.xlu1 %v1739_v0, %s1561_s18  ;;  %674 = vrot.lane.b32.xlu0 %v1750_v2, %s1561_s18 }
  0xe8   : > { %v289_v38 = vpop.permute.xlu1 %288  ;;  %v1930_v39 = vpop.permute.xlu0 %364 }
  0xe9   : > { %v297_v40 = vsel %vm296_vm3, %v289_v38, %v291_v20  ;;  %v370_v41 = vsel %vm368_vm6, %v363_v35, %v1930_v39  ;;  %v795_v50 = vld [vmem:[#allocation2 + $0x38] sm:$0xff] }
  0xea   : > { %303 = vst [vmem:[#allocation2 + $0x30] sm:$0xf] %v297_v40  ;;  %376 = vst [vmem:[#allocation2 + $0x50] sm:$0xf0] %v370_v41  ;;  %700 = vrot.lane.b32.xlu1 %v1759_v3, %s1562_s25  ;;  %698 = vrot.lane.b32.xlu0 %v1742_v1, %s1562_s25 }
  0xec   : > { %v337_v42 = vpop.permute.xlu1 %336  ;;  %v313_v43 = vpop.permute.xlu0 %312 }
  0xed   : > { %v345_v44 = vsel %vm344_vm5, %v337_v42, %v339_v29  ;;  %v321_v45 = vsel %vm320_vm4, %v313_v43, %v315_v26  ;;  %v1566_v26 = vmov 0.0  }
  0xee   : > { %351 = vst [vmem:[#allocation2 + $0x48] sm:$0xf] %v345_v44  ;;  %327 = vst [vmem:[#allocation2 + $0x30] sm:$0xf0] %v321_v45  ;;  %724 = vrot.lane.b32.xlu1 %v1739_v0, %s1563_s26  ;;  %722 = vrot.lane.b32.xlu0 %v1750_v2, %s1563_s26 }
  0xef   : > { %908 = vmatprep.mubr.f32.mxu0 %v1566_v26 }
  0xf0   : > { %v223_v46 = vpop.permute.xlu1 %222  ;;  %v361_v47 = vpop.permute.xlu0 %360 }
  0xf1   : > { %v227_v48 = vsel %vm224_vm2, %v1885_v13, %v223_v46  ;;  %v369_v49 = vsel %vm368_vm6, %v361_v47, %v363_v35  ;;  %v798_v51 = vld [vmem:[#allocation2 + $0x50] sm:$0xff]  ;;  %vm632_vm2 = vcmask 531456  }
  0xf2   : > { %233 = vst [vmem:[#allocation2 + $0x10] sm:$0xf0] %v227_v48  ;;  %375 = vst [vmem:[#allocation2 + $0x48] sm:$0xf0] %v369_v49  ;;  %748 = vrot.lane.b32.xlu1 %v1759_v3, %s1564_s5  ;;  %746 = vrot.lane.b32.xlu0 %v1742_v1, %s1564_s5  ;;  %v1258_v52 = vpack.c.bf16 %v798_v51, %v795_v50 }
  0xf4   : > { %v271_v53 = vpop.permute.xlu1 %270  ;;  %v247_v54 = vpop.permute.xlu0 %246  ;;  %1259 = vmatprep.subr.bf16.mxu0 %v1258_v52 }
  0xf5   : > { %v275_v55 = vsel %vm272_vm1, %v1883_v12, %v271_v53  ;;  %v251_v56 = vsel %vm248_vm0, %v1871_v7, %v247_v54  ;;  %v794_v60 = vld [vmem:[#allocation2 + $0x30] sm:$0xff]  ;;  %vm584_vm0 = vcmask 547840   ;;  %vm608_vm1 = vcmask 539648  }
  0xf6   : > { %281 = vst [vmem:[#allocation2 + $0x28] sm:$0xf0] %v275_v55  ;;  %257 = vst [vmem:[#allocation2 + $0x28] sm:$0xf] %v251_v56  ;;  %696 = vrot.lane.b32.xlu1 %v1763_v4, %s1562_s25  ;;  %672 = vrot.lane.b32.xlu0 %v1742_v1, %s1561_s18 }
  0xf8   : > { %v1960_v57 = vpop.permute.xlu1 %388  ;;  %v387_v58 = vpop.permute.xlu0 %386 }
  0xf9   : > { %v394_v59 = vsel %vm392_vm7, %v387_v58, %v1960_v57  ;;  %v797_v61 = vld [vmem:[#allocation2 + $0x48] sm:$0xff]  ;;  %v790_v7 = vld [vmem:[#allocation2 + $0x10] sm:$0xff] }
  0xfa   : > { %400 = vst [vmem:[#allocation2 + $0x68] sm:$0xf] %v394_v59  ;;  %744 = vrot.lane.b32.xlu1 %v1763_v4, %s1564_s5  ;;  %720 = vrot.lane.b32.xlu0 %v1742_v1, %s1563_s26  ;;  %v1260_v62 = vpack.c.bf16 %v797_v61, %v794_v60 }
  0xfc   : > { %v1968_v63 = vpop.permute.xlu1 %412  ;;  %v411_v3 = vpop.permute.xlu0 %410  ;;  %1261 = vmatpush1.bf16.msra.mxu0 %v1260_v62 }
  0xfd   : > { %v418_v5 = vsel %vm416_vm8, %v411_v3, %v1968_v63  ;;  %v793_v8 = vld [vmem:[#allocation2 + $0x28] sm:$0xff] }
  0xfe   : > { %424 = vst [vmem:[#allocation2 + $0x68] sm:$0xf0] %v418_v5  ;;  %606 = vrot.lane.b32.xlu1 %v1739_v0, %s1558_s7  ;;  %582 = vrot.lane.b32.xlu0 %v1798_v6, %s1557_s6  ;;  %v1278_v4 = vpack.c.bf16 %v793_v8, %v790_v7  ;;  %s2140_s6 = scalar_lea.hbm %s2187_s3, %s1303_s27  ;;  %s1466_s7 = scalar_lea.vmem %s2142_s29, 384 }
  0xff   : > { %p1467_p4 = scmp.ne.s32.totalorder %s2142_s29, %s1466_s7 }
 0x100   : > { %v1976_v9 = vpop.permute.xlu1 %436  ;;  %v435_v10 = vpop.permute.xlu0 %434  ;;  %1279 = vmatprep.subr.bf16.mxu1 %v1278_v4 }
 0x101   : > { %v442_v11 = vsel %vm440_vm9, %v435_v10, %v1976_v9  ;;  %1281 = vmatpush3.bf16.msra.mxu1 %v1278_v4  ;;  %p1468_p6 = pnand %p1467_p4, %p1679_p12 }
 0x102   : > { %448 = vst [vmem:[#allocation2 + $0x80] sm:$0xf] %v442_v11  ;;  %654 = vrot.lane.b32.xlu1 %v1739_v0, %s1560_s4  ;;  %630 = vrot.lane.b32.xlu0 %v1798_v6, %s1559_s20  ;;  %s1567_s20 = smov [#allocation8]  }
 0x103   : > { %p1469_p8 = pneg %p1468_p6  ;;  %s1470_s4 = sshll.u32 %s1567_s20, 4  ;;  %s1471_s4 = int_to_ptr.vmem [resolvable:$false] %s1470_s4 }
 0x104   : > { %v1984_v12 = vpop.permute.xlu1 %460  ;;  %v459_v13 = vpop.permute.xlu0 %458  ;;  %p1473_p10 = scmp.lt.s32.totalorder %s2142_s29, %s1471_s4 }
 0x105   : > { %v466_v14 = vsel %vm464_vm10, %v459_v13, %v1984_v12  ;;  %v801_v22 = vld [vmem:[#allocation2 + $0x68] sm:$0xff] }
 0x106   : > { %472 = vst [vmem:[#allocation2 + $0x80] sm:$0xf0] %v466_v14  ;;  %772 = vrot.lane.b32.xlu1 %v1739_v0, %s1565_s8  ;;  %770 = vrot.lane.b32.xlu0 %v1750_v2, %s1565_s8 }
 0x108   : > { %v409_v15 = vpop.permute.xlu1 %408  ;;  %v385_v16 = vpop.permute.xlu0 %384 }
 0x109   : > { %v417_v17 = vsel %vm416_vm8, %v409_v15, %v411_v3  ;;  %v393_v18 = vsel %vm392_vm7, %v385_v16, %v387_v58 }
 0x10a   : > { %423 = vst [vmem:[#allocation2 + $0x60] sm:$0xf0] %v417_v17  ;;  %399 = vst [vmem:[#allocation2 + $0x60] sm:$0xf] %v393_v18  ;;  %702 = vrot.lane.b32.xlu1 %v1739_v0, %s1562_s25  ;;  %678 = vrot.lane.b32.xlu0 %v1798_v6, %s1561_s18  ;;  %s1472_s18 = scalar_lea.vmem %s1471_s4, 768 }
 0x10b   : > { %p1474_p13 = scmp.lt.s32.totalorder %s1472_s18, %s1466_s7 }
 0x10c   : > { %v457_v19 = vpop.permute.xlu1 %456  ;;  %v433_v20 = vpop.permute.xlu0 %432 }
 0x10d   : > { %v465_v21 = vsel %vm464_vm10, %v457_v19, %v459_v13  ;;  %v441_v2 = vsel %vm440_vm9, %v433_v20, %v435_v10  ;;  %v804_v23 = vld [vmem:[#allocation2 + $0x80] sm:$0xff]  ;;  %p1475_p3 = por %p1474_p13, %p1473_p10 }
 0x10e   : > { %471 = vst [vmem:[#allocation2 + $0x78] sm:$0xf0] %v465_v21  ;;  %447 = vst [vmem:[#allocation2 + $0x78] sm:$0xf] %v441_v2  ;;  %750 = vrot.lane.b32.xlu1 %v1739_v0, %s1564_s5  ;;  %726 = vrot.lane.b32.xlu0 %v1798_v6, %s1563_s26  ;;  %v1262_v24 = vpack.c.bf16 %v804_v23, %v801_v22 }
 0x10f   : > { %p1476_p7 = pnand %p1475_p3, %p1469_p8 }
 0x110   : > { %v319_v28 = vpop.permute.xlu1 %318  ;;  %v295_v29 = vpop.permute.xlu0 %294  ;;  %1263 = vmatprep.subr.bf16.mxu0 %v1262_v24 }
 0x111   : > { %v323_v31 = vsel %vm320_vm4, %v1914_v30, %v319_v28  ;;  %v299_v0 = vsel %vm296_vm3, %v1906_v27, %v295_v29  ;;  %v800_v30 = vld [vmem:[#allocation2 + $0x60] sm:$0xff]  ;;  %vm656_vm3 = vcmask 523264   ;;  %vm680_vm4 = vcmask 392192  }
 0x112   : > { %329 = vst [vmem:[#allocation2 + $0x40] sm:$0xf0] %v323_v31  ;;  %305 = vst [vmem:[#allocation2 + $0x40] sm:$0xf] %v299_v0  ;;  %774 = vrot.lane.b32.xlu1 %v1798_v6, %s1565_s8  ;;  %768 = vrot.lane.b32.xlu0 %v1742_v1, %s1565_s8 }
 0x114   : > { %v367_v32 = vpop.permute.xlu1 %366  ;;  %v343_v33 = vpop.permute.xlu0 %342 }
 0x115   : > { %v371_v34 = vsel %vm368_vm6, %v1930_v39, %v367_v32  ;;  %v347_v35 = vsel %vm344_vm5, %v1922_v36, %v343_v33  ;;  %v803_v37 = vld [vmem:[#allocation2 + $0x78] sm:$0xff]  ;;  %vm704_vm5 = vcmask 384000   ;;  %vm728_vm6 = vcmask 375808  }
 0x116   : > { %377 = vst [vmem:[#allocation2 + $0x58] sm:$0xf0] %v371_v34  ;;  %353 = vst [vmem:[#allocation2 + $0x58] sm:$0xf] %v347_v35  ;;  %v1264_v27 = vpack.c.bf16 %v803_v37, %v800_v30 }
 0x118   : > { %v2021_v38 = vpop.permute.xlu1 %484  ;;  %v483_v6 = vpop.permute.xlu0 %482  ;;  %1265 = vmatpush1.bf16.msra.mxu0 %v1264_v27 }
 0x119   : > { %v490_v1 = vsel %vm488_vm12, %v483_v6, %v2021_v38  ;;  %v796_v41 = vld [vmem:[#allocation2 + $0x40] sm:$0xff] }
 0x11a   : > { %496 = vst [vmem:[#allocation2 + $0x98] sm:$0xf] %v490_v1 }
 0x11c   : > { %v2025_v40 = vpop.permute.xlu1 %508  ;;  %v507_v39 = vpop.permute.xlu0 %506 }
 0x11d   : > { %v514_v36 = vsel %vm512_vm13, %v507_v39, %v2025_v40  ;;  %v799_v42 = vld [vmem:[#allocation2 + $0x58] sm:$0xff] }
 0x11e   : > { %520 = vst [vmem:[#allocation2 + $0x98] sm:$0xf0] %v514_v36  ;;  %v1282_v43 = vpack.c.bf16 %v799_v42, %v796_v41 }
 0x120   : > { %v2029_v44 = vpop.permute.xlu1 %532  ;;  %v531_v45 = vpop.permute.xlu0 %530  ;;  %1283 = vmatprep.subr.bf16.mxu1 %v1282_v43 }
 0x121   : > { %v538_v46 = vsel %vm536_vm14, %v531_v45, %v2029_v44  ;;  %1285 = vmatpush3.bf16.msra.mxu1 %v1282_v43 }
 0x122   : > { %544 = vst [vmem:[#allocation2 + $0xb0] sm:$0xf] %v538_v46 }
 0x124   : > { %v2033_v47 = vpop.permute.xlu1 %556  ;;  %v555_v48 = vpop.permute.xlu0 %554 }
 0x125   : > { %v562_v49 = vsel %vm560_vm15, %v555_v48, %v2033_v47  ;;  %v807_v59 = vld [vmem:[#allocation2 + $0x98] sm:$0xff] }
 0x126   : > { %568 = vst [vmem:[#allocation2 + $0xb0] sm:$0xf0] %v562_v49 }
 0x128   : > { %v505_v50 = vpop.permute.xlu1 %504  ;;  %v481_v51 = vpop.permute.xlu0 %480 }
 0x129   : > { %v513_v52 = vsel %vm512_vm13, %v505_v50, %v507_v39  ;;  %v489_v53 = vsel %vm488_vm12, %v481_v51, %v483_v6 }
 0x12a   : > { %519 = vst [vmem:[#allocation2 + $0x90] sm:$0xf0] %v513_v52  ;;  %495 = vst [vmem:[#allocation2 + $0x90] sm:$0xf] %v489_v53 }
 0x12c   : > { %v553_v54 = vpop.permute.xlu1 %552  ;;  %v529_v55 = vpop.permute.xlu0 %528 }
 0x12d   : > { %v561_v56 = vsel %vm560_vm15, %v553_v54, %v555_v48  ;;  %v537_v58 = vsel %vm536_vm14, %v529_v55, %v531_v45  ;;  %v810_v60 = vld [vmem:[#allocation2 + $0xb0] sm:$0xff] }
 0x12e   : > { %567 = vst [vmem:[#allocation2 + $0xa8] sm:$0xf0] %v561_v56  ;;  %543 = vst [vmem:[#allocation2 + $0xa8] sm:$0xf] %v537_v58  ;;  %v1266_v61 = vpack.c.bf16 %v810_v60, %v807_v59 }
 0x130   : > { %v415_v62 = vpop.permute.xlu1 %414  ;;  %v391_v3 = vpop.permute.xlu0 %390  ;;  %1267 = vmatprep.subr.bf16.mxu0 %v1266_v61 }
 0x131   : > { %v419_v5 = vsel %vm416_vm8, %v1968_v63, %v415_v62  ;;  %v395_v7 = vsel %vm392_vm7, %v1960_v57, %v391_v3  ;;  %v806_v13 = vld [vmem:[#allocation2 + $0x90] sm:$0xff]  ;;  %vm752_vm7 = vcmask 367616   ;;  %vm776_vm8 = vcmask 359424  }
 0x132   : > { %425 = vst [vmem:[#allocation2 + $0x70] sm:$0xf0] %v419_v5  ;;  %401 = vst [vmem:[#allocation2 + $0x70] sm:$0xf] %v395_v7 }
 0x134   : > { %v463_v8 = vpop.permute.xlu1 %462  ;;  %v439_v4 = vpop.permute.xlu0 %438 }
 0x135   : > { %v467_v10 = vsel %vm464_vm10, %v1984_v12, %v463_v8  ;;  %v443_v11 = vsel %vm440_vm9, %v1976_v9, %v439_v4  ;;  %v809_v14 = vld [vmem:[#allocation2 + $0xa8] sm:$0xff]  ;;  %vm834_vm9 = vcmask 1043456  }
 0x136   : > { %473 = vst [vmem:[#allocation2 + $0x88] sm:$0xf0] %v467_v10  ;;  %449 = vst [vmem:[#allocation2 + $0x88] sm:$0xf] %v443_v11  ;;  %v1268_v15 = vpack.c.bf16 %v809_v14, %v806_v13 }
 0x138   : > { %v2049_v63 = vpop.permute.xlu1 %580  ;;  %v579_v16 = vpop.permute.xlu0 %578  ;;  %1269 = vmatpush1.bf16.msra.mxu0 %v1268_v15 }
 0x139   : > { %v586_v57 = vsel %vm584_vm0, %v579_v16, %v2049_v63  ;;  %v802_v18 = vld [vmem:[#allocation2 + $0x70] sm:$0xff] }
 0x13a   : > { %592 = vst [vmem:[#allocation2 + $0xc8] sm:$0xf] %v586_v57 }
 0x13c   : > { %v2053_v17 = vpop.permute.xlu1 %604  ;;  %v603_v12 = vpop.permute.xlu0 %602 }
 0x13d   : > { %v610_v9 = vsel %vm608_vm1, %v603_v12, %v2053_v17  ;;  %v805_v19 = vld [vmem:[#allocation2 + $0x88] sm:$0xff] }
 0x13e   : > { %616 = vst [vmem:[#allocation2 + $0xc8] sm:$0xf0] %v610_v9  ;;  %v1286_v20 = vpack.c.bf16 %v805_v19, %v802_v18 }
 0x140   : > { %v2057_v21 = vpop.permute.xlu1 %628  ;;  %v627_v2 = vpop.permute.xlu0 %626  ;;  %1287 = vmatprep.subr.bf16.mxu1 %v1286_v20 }
 0x141   : > { %v634_v22 = vsel %vm632_vm2, %v627_v2, %v2057_v21  ;;  %1289 = vmatpush3.bf16.msra.mxu1 %v1286_v20 }
 0x142   : > { %640 = vst [vmem:[#allocation2 + $0xe0] sm:$0xf] %v634_v22 }
 0x144   : > { %v2061_v23 = vpop.permute.xlu1 %652  ;;  %v651_v24 = vpop.permute.xlu0 %650 }
 0x145   : > { %v658_v28 = vsel %vm656_vm3, %v651_v24, %v2061_v23  ;;  %v813_v37 = vld [vmem:[#allocation2 + $0xc8] sm:$0xff] }
 0x146   : > { %664 = vst [vmem:[#allocation2 + $0xe0] sm:$0xf0] %v658_v28 }
 0x148   : > { %v601_v29 = vpop.permute.xlu1 %600  ;;  %v577_v31 = vpop.permute.xlu0 %576 }
 0x149   : > { %v609_v0 = vsel %vm608_vm1, %v601_v29, %v603_v12  ;;  %v585_v32 = vsel %vm584_vm0, %v577_v31, %v579_v16 }
 0x14a   : > { %615 = vst [vmem:[#allocation2 + $0xc0] sm:$0xf0] %v609_v0  ;;  %591 = vst [vmem:[#allocation2 + $0xc0] sm:$0xf] %v585_v32 }
 0x14c   : > { %v649_v33 = vpop.permute.xlu1 %648  ;;  %v625_v34 = vpop.permute.xlu0 %624 }
 0x14d   : > { %v657_v35 = vsel %vm656_vm3, %v649_v33, %v651_v24  ;;  %v633_v30 = vsel %vm632_vm2, %v625_v34, %v627_v2  ;;  %v816_v27 = vld [vmem:[#allocation2 + $0xe0] sm:$0xff] }
 0x14e   : > { %663 = vst [vmem:[#allocation2 + $0xd8] sm:$0xf0] %v657_v35  ;;  %639 = vst [vmem:[#allocation2 + $0xd8] sm:$0xf] %v633_v30  ;;  %v1270_v6 = vpack.c.bf16 %v816_v27, %v813_v37 }
 0x150   : > { %v511_v1 = vpop.permute.xlu1 %510  ;;  %v487_v39 = vpop.permute.xlu0 %486  ;;  %1271 = vmatprep.subr.bf16.mxu0 %v1270_v6 }
 0x151   : > { %v515_v36 = vsel %vm512_vm13, %v2025_v40, %v511_v1  ;;  %v491_v41 = vsel %vm488_vm12, %v2021_v38, %v487_v39  ;;  %v812_v48 = vld [vmem:[#allocation2 + $0xc0] sm:$0xff] }
 0x152   : > { %521 = vst [vmem:[#allocation2 + $0xa0] sm:$0xf0] %v515_v36  ;;  %497 = vst [vmem:[#allocation2 + $0xa0] sm:$0xf] %v491_v41 }
 0x154   : > { %v559_v42 = vpop.permute.xlu1 %558  ;;  %v535_v43 = vpop.permute.xlu0 %534 }
 0x155   : > { %v563_v45 = vsel %vm560_vm15, %v2033_v47, %v559_v42  ;;  %v539_v46 = vsel %vm536_vm14, %v2029_v44, %v535_v43  ;;  %v815_v49 = vld [vmem:[#allocation2 + $0xd8] sm:$0xff] }
 0x156   : > { %569 = vst [vmem:[#allocation2 + $0xb8] sm:$0xf0] %v563_v45  ;;  %545 = vst [vmem:[#allocation2 + $0xb8] sm:$0xf] %v539_v46  ;;  %v1272_v50 = vpack.c.bf16 %v815_v49, %v812_v48 }
 0x158   : > { %v2077_v40 = vpop.permute.xlu1 %676  ;;  %v675_v51 = vpop.permute.xlu0 %674  ;;  %1273 = vmatpush1.bf16.msra.mxu0 %v1272_v50  ;;  %v787_v50 = vld [vmem:[#allocation6 + $0x8] sm:$0xff] }
 0x159   : > { %v682_v38 = vsel %vm680_vm4, %v675_v51, %v2077_v40  ;;  %v808_v44 = vld [vmem:[#allocation2 + $0xa0] sm:$0xff] }
 0x15a   : > { %688 = vst [vmem:[#allocation2 + $0xf8] sm:$0xf] %v682_v38 }
 0x15c   : > { %v701_v52 = vpop.permute.xlu1 %700  ;;  %v699_v47 = vpop.permute.xlu0 %698 }
 0x15d   : > { %v706_v53 = vsel %vm704_vm5, %v699_v47, %v701_v52  ;;  %v811_v54 = vld [vmem:[#allocation2 + $0xb8] sm:$0xff] }
 0x15e   : > { %712 = vst [vmem:[#allocation2 + $0xf8] sm:$0xf0] %v706_v53  ;;  %v1290_v55 = vpack.c.bf16 %v811_v54, %v808_v44 }
 0x160   : > { %v2082_v56 = vpop.permute.xlu1 %724  ;;  %v723_v58 = vpop.permute.xlu0 %722  ;;  %1291 = vmatprep.subr.bf16.mxu1 %v1290_v55 }
 0x161   : > { %v730_v59 = vsel %vm728_vm6, %v723_v58, %v2082_v56  ;;  %1293 = vmatpush3.bf16.msra.mxu1 %v1290_v55 }
 0x162   : > { %736 = vst [vmem:[#allocation2 + $0x110] sm:$0xf] %v730_v59 }
 0x164   : > { %v749_v60 = vpop.permute.xlu1 %748  ;;  %v747_v61 = vpop.permute.xlu0 %746 }
 0x165   : > { %v754_v62 = vsel %vm752_vm7, %v747_v61, %v749_v60  ;;  %v819_v14 = vld [vmem:[#allocation2 + $0xf8] sm:$0xff] }
 0x166   : > { %760 = vst [vmem:[#allocation2 + $0x110] sm:$0xf0] %v754_v62 }
 0x168   : > { %v697_v3 = vpop.permute.xlu1 %696  ;;  %v673_v5 = vpop.permute.xlu0 %672 }
 0x169   : > { %v705_v7 = vsel %vm704_vm5, %v697_v3, %v699_v47  ;;  %v681_v8 = vsel %vm680_vm4, %v673_v5, %v675_v51 }
 0x16a   : > { %711 = vst [vmem:[#allocation2 + $0xf0] sm:$0xf0] %v705_v7  ;;  %687 = vst [vmem:[#allocation2 + $0xf0] sm:$0xf] %v681_v8 }
 0x16c   : > { %v745_v4 = vpop.permute.xlu1 %744  ;;  %v721_v10 = vpop.permute.xlu0 %720 }
 0x16d   : > { %v753_v11 = vsel %vm752_vm7, %v745_v4, %v747_v61  ;;  %v729_v13 = vsel %vm728_vm6, %v721_v10, %v723_v58  ;;  %v822_v15 = vld [vmem:[#allocation2 + $0x110] sm:$0xff] }
 0x16e   : > { %759 = vst [vmem:[#allocation2 + $0x108] sm:$0xf0] %v753_v11  ;;  %735 = vst [vmem:[#allocation2 + $0x108] sm:$0xf] %v729_v13  ;;  %v1274_v16 = vpack.c.bf16 %v822_v15, %v819_v14 }
 0x170   : > { %v607_v57 = vpop.permute.xlu1 %606  ;;  %v583_v12 = vpop.permute.xlu0 %582  ;;  %1275 = vmatprep.subr.bf16.mxu0 %v1274_v16 }
 0x171   : > { %v611_v9 = vsel %vm608_vm1, %v2053_v17, %v607_v57  ;;  %v587_v18 = vsel %vm584_vm0, %v2049_v63, %v583_v12  ;;  %v818_v24 = vld [vmem:[#allocation2 + $0xf0] sm:$0xff] }
 0x172   : > { %617 = vst [vmem:[#allocation2 + $0xd0] sm:$0xf0] %v611_v9  ;;  %593 = vst [vmem:[#allocation2 + $0xd0] sm:$0xf] %v587_v18 }
 0x174   : > { %v655_v19 = vpop.permute.xlu1 %654  ;;  %v631_v20 = vpop.permute.xlu0 %630 }
 0x175   : > { %v659_v2 = vsel %vm656_vm3, %v2061_v23, %v655_v19  ;;  %v635_v22 = vsel %vm632_vm2, %v2057_v21, %v631_v20  ;;  %v821_v28 = vld [vmem:[#allocation2 + $0x108] sm:$0xff] }
 0x176   : > { %665 = vst [vmem:[#allocation2 + $0xe8] sm:$0xf0] %v659_v2  ;;  %641 = vst [vmem:[#allocation2 + $0xe8] sm:$0xf] %v635_v22  ;;  %v1276_v29 = vpack.c.bf16 %v821_v28, %v818_v24 }
 0x178   : > { %v773_v17 = vpop.permute.xlu1 %772  ;;  %v771_v31 = vpop.permute.xlu0 %770  ;;  %1277 = vmatpush1.bf16.msra.mxu0 %v1276_v29 }
 0x179   : > { %v778_v63 = vsel %vm776_vm8, %v771_v31, %v773_v17  ;;  %v814_v21 = vld [vmem:[#allocation2 + $0xd0] sm:$0xff] }
 0x17a   : > { %784 = vst [vmem:[#allocation2 + $0x128] sm:$0xf] %v778_v63 }
 0x17c   : > { %v703_v0 = vpop.permute.xlu1 %702  ;;  %v679_v32 = vpop.permute.xlu0 %678 }
 0x17d   : > { %v707_v33 = vsel %vm704_vm5, %v701_v52, %v703_v0  ;;  %v683_v23 = vsel %vm680_vm4, %v2077_v40, %v679_v32  ;;  %v817_v34 = vld [vmem:[#allocation2 + $0xe8] sm:$0xff]  ;;  %v998_v40 = vlaneseq  ;;  %v996_v52 = vld [vmem:[%s2186_s2] sm:$0x7] }
 0x17e   : > { %713 = vst [vmem:[#allocation2 + $0x100] sm:$0xf0] %v707_v33  ;;  %689 = vst [vmem:[#allocation2 + $0x100] sm:$0xf] %v683_v23  ;;  %v1294_v35 = vpack.c.bf16 %v817_v34, %v814_v21 }
 0x17f   : > { %v999_v51 = vshrl.u32 %v998_v40, 7 }
 0x180   : > { %v751_v30 = vpop.permute.xlu1 %750  ;;  %v727_v37 = vpop.permute.xlu0 %726  ;;  %1295 = vmatprep.subr.bf16.mxu1 %v1294_v35 }
 0x181   : > { %v755_v27 = vsel %vm752_vm7, %v749_v60, %v751_v30  ;;  %v731_v6 = vsel %vm728_vm6, %v2082_v56, %v727_v37  ;;  %1297 = vmatpush3.bf16.msra.mxu1 %v1294_v35  ;;  %v825_v1 = vld [vmem:[#allocation2 + $0x128] sm:$0xf]  ;;  %v1000_v38 = vsub.s32 0, %v999_v51  ;;  %v1004_v47 = vsub.s32 1, %v999_v51 }
 0x182   : > { %761 = vst [vmem:[#allocation2 + $0x118] sm:$0xf0] %v755_v27  ;;  %737 = vst [vmem:[#allocation2 + $0x118] sm:$0xf] %v731_v6  ;;  %1196 = vmatprep.subr.msk.mxu0 %vm834_vm9, %v825_v1  ;;  %v1008_v44 = vsub.s32 2, %v999_v51 }
 0x183   : > { %v1001_v53 = vrot.slane %v996_v52, %v1000_v38 }
 0x184   : > { %v775_v39 = vpop.permute.xlu1 %774  ;;  %v769_v36 = vpop.permute.xlu0 %768  ;;  %v1009_v56 = vrot.slane %v996_v52, %v1008_v44 }
 0x185   : > { %v779_v41 = vsel %vm776_vm8, %v773_v17, %v775_v39  ;;  %v777_v42 = vsel %vm776_vm8, %v769_v36, %v771_v31  ;;  %v820_v43 = vld [vmem:[#allocation2 + $0x100] sm:$0xff] }
 0x186   : > { %785 = vst [vmem:[#allocation2 + $0x130] sm:$0xf] %v779_v41  ;;  %783 = vst [vmem:[#allocation2 + $0x120] sm:$0xf] %v777_v42 }
 0x189   : > { %v823_v45 = vld [vmem:[#allocation2 + $0x118] sm:$0xff] }
 0x18a   : > { %v1298_v46 = vpack.c.bf16 %v823_v45, %v820_v43 }
 0x18c   : > { %1299 = vmatprep.subr.bf16.mxu1 %v1298_v46 }
 0x18d   : > { %1301 = vmatpush3.bf16.msra.mxu1 %v1298_v46  ;;  %v824_v48 = vld [vmem:[#allocation2 + $0x120] sm:$0xf]  ;;  %v826_v49 = vld [vmem:[#allocation2 + $0x130] sm:$0xf] }
 0x18e   : > { %1197 = vmatpush1.msk.msra.mxu0 %vm834_vm9, %v824_v48  ;;  %1249 = vmatprep.subr.msk.mxu1 %vm834_vm9, %v826_v49 }
 0x18f   : > { %1198 = vmatmul.mubr.msk.f32.vlgmr.msra.gmra.mrb[0].mxu0 %vm827_vm11, %v2004_v25  ;;  %v1005_v25 = vrot.slane %v996_v52, %v1004_v47 }
 0x190   : > { %914 = vmatprep.mubr.f32.mxu0 %v1566_v26 }
 0x191   : > { %1250 = vmatpush3.msk.msra.mxu1 %vm834_vm9, %v826_v49 }
 0x192   : > { %1252 = vmatmul.mubr.msk.f32.vlgmr.msra.gmra.mrb[0].mxu1 %vm827_vm11, %v787_v50 }
 0x193   : > { %1199 = vmatmul.mubr.msk.f32.gmra.mrb[2].mxu0 %vm827_vm11, %v787_v50 }
 0x262   : > { %v2120_v54 = vpop.f32.mrb[0].mxu0 }
 0x263   : > { %v1013_v26 = vmul.f32 %v1001_v53, %v2120_v54  ;;  %v2123_v55 = vpop.f32.mrb[1].mxu0 }
 0x264   : > { %v1014_v58 = vmul.f32 %v1005_v25, %v2123_v55 }
 0x265   : > { %v1027_v59 = vmul.f32 %v1013_v26, %v2120_v54  ;;  %v1253_v60 = vpop.f32.mrb[0].mxu1 }
 0x266   : > { %v1019_v61 = vadd.f32 %v1014_v58, %v1013_v26  ;;  %v1028_v62 = vmul.f32 %v1014_v58, %v2123_v55  ;;  %v916_v3 = vpop.f32.mrb[2].mxu0  ;;  %v2128_v5 = vpop.f32.mrb[1].mxu1  ;;  %v1018_v13 = vmul.f32 %v1253_v60, %v1009_v56 }
 0x267   : > { %v1016_v7 = vmul.f32 %v1001_v53, %v916_v3  ;;  %v1015_v8 = vmul.f32 %v1009_v56, %v2128_v5  ;;  %v918_v4 = vpop.f32.mrb[3].mxu0 }
 0x268   : > { %v1033_v10 = vadd.f32 %v1028_v62, %v1027_v59  ;;  %v1017_v11 = vmul.f32 %v1005_v25, %v918_v4  ;;  %v1032_v19 = vmul.f32 %v1253_v60, %v1018_v13 }
 0x269   : > { %v1030_v14 = vmul.f32 %v1016_v7, %v916_v3  ;;  %v1020_v15 = vadd.f32 %v1019_v61, %v1015_v8  ;;  %v1029_v16 = vmul.f32 %v1015_v8, %v2128_v5 }
 0x26a   : > { %v1031_v57 = vmul.f32 %v1017_v11, %v918_v4  ;;  %v1023_v12 = vadd.f32 %v1017_v11, %v1016_v7 }
 0x26b   : > { %v1034_v9 = vadd.f32 %v1033_v10, %v1029_v16 }
 0x26c   : > { %v1024_v18 = vadd.f32 %v1023_v12, %v1018_v13  ;;  %v1037_v20 = vadd.f32 %v1031_v57, %v1030_v14 }
 0x26e   : > { %1025 = vadd.xlane.f32.xlu0 %v1024_v18  ;;  %v1038_v2 = vadd.f32 %v1037_v20, %v1032_v19 }
 0x270   : > { %1039 = vadd.xlane.f32.xlu1 %v1038_v2 }
 0x272   : > { %1021 = vadd.xlane.f32.xlu0 %v1020_v15 }
 0x276   : > { %1035 = vadd.xlane.f32.xlu0 %v1034_v9 }
 0x2fb   : > { %v1026_v22 = vpop.xlane.xlu0 %1025 }
 0x2fc   : > { %v1042_v24 = vmul.f32 0.00390625, %v1026_v22 }
 0x2fd   : > { %v1040_v28 = vpop.xlane.xlu1 %1039 }
 0x2fe   : > { %v1044_v29 = vmul.f32 0.00390625, %v1040_v28  ;;  %v1046_v17 = vmul.f32 %v1042_v24, %v1042_v24  ;;  %v1054_v34 = vsub.f32 %v916_v3, %v1042_v24  ;;  %v1055_v35 = vsub.f32 %v918_v4, %v1042_v24 }
 0x2ff   : > { %v1022_v32 = vpop.xlane.xlu0 %1021  ;;  %v1056_v30 = vsub.f32 %v1253_v60, %v1042_v24 }
 0x300   : > { %v1048_v31 = vsub.f32 %v1044_v29, %v1046_v17  ;;  %v1041_v23 = vmul.f32 0.00390625, %v1022_v32 }
 0x302   : > { %v1050_v63 = vmax.f32 %v1048_v31, 0.0  ;;  %v1045_v27 = vmul.f32 %v1041_v23, %v1041_v23  ;;  %v1051_v47 = vsub.f32 %v2120_v54, %v1041_v23  ;;  %v1052_v53 = vsub.f32 %v2123_v55, %v1041_v23 }
 0x303   : > { %v1036_v33 = vpop.xlane.xlu0 %1035  ;;  %v1053_v44 = vsub.f32 %v2128_v5, %v1041_v23 }
 0x304   : > { %v1058_v0 = vadd.f32 1e-05, %v1050_v63  ;;  %v1043_v21 = vmul.f32 0.00390625, %v1036_v33 }
 0x306   : > { %1392 = vrsqrt.f32 %v1058_v0  ;;  %v1047_v36 = vsub.f32 %v1043_v21, %v1045_v27 }
 0x308   : > { %v1049_v45 = vmax.f32 %v1047_v36, 0.0 }
 0x30a   : > { %v1057_v46 = vadd.f32 1e-05, %v1049_v45 }
 0x310   : > { %v1393_v37 = vpop.eup %1392 }
 0x311   : > { %v1064_v6 = vmul.f32 %v1393_v37, %v1054_v34  ;;  %v1065_v1 = vmul.f32 %v1393_v37, %v1055_v35  ;;  %v1066_v39 = vmul.f32 %v1393_v37, %v1056_v30 }
 0x313   : > { %v1203_v41 = vmul.f32 -1.442695, %v1064_v6  ;;  %v1204_v42 = vmul.f32 -1.442695, %v1065_v1  ;;  %v1205_v43 = vmul.f32 -1.442695, %v1066_v39 }
 0x315   : > { %1394 = vpow2.f32 %v1203_v41 }
 0x316   : > { %1396 = vpow2.f32 %v1204_v42 }
 0x317   : > { %1398 = vpow2.f32 %v1205_v43 }
 0x318   : > { %1400 = vrsqrt.f32 %v1057_v46 }
 0x31f   : > { %v1395_v48 = vpop.eup %1394 }
 0x320   : > { %v1397_v49 = vpop.eup %1396  ;;  %v1076_v50 = vadd.f32 1.0, %v1395_v48 }
 0x321   : > { %v1399_v40 = vpop.eup %1398  ;;  %v1077_v51 = vadd.f32 1.0, %v1397_v49 }
 0x322   : > { %v1078_v38 = vadd.f32 1.0, %v1399_v40  ;;  %1402 = vrcp.f32 %v1076_v50  ;;  %v1401_v52 = vpop.eup %1400 }
 0x323   : > { %1404 = vrcp.f32 %v1077_v51  ;;  %v1061_v25 = vmul.f32 %v1401_v52, %v1051_v47  ;;  %v1062_v56 = vmul.f32 %v1401_v52, %v1052_v53  ;;  %v1063_v59 = vmul.f32 %v1401_v52, %v1053_v44 }
 0x324   : > { %1406 = vrcp.f32 %v1078_v38 }
 0x32c   : > { %v1403_v26 = vpop.eup %1402 }
 0x32d   : > { %v1405_v58 = vpop.eup %1404  ;;  %v1085_v60 = vmul.f32 %v1403_v26, %v1061_v25 }
 0x32e   : > { %v1407_v61 = vpop.eup %1406  ;;  %v1086_v62 = vmul.f32 %v1405_v58, %v1062_v56 }
 0x32f   : > { %v1087_v3 = vmul.f32 %v1407_v61, %v1063_v59  ;;  %1088 = vst [vmem:[%s201_s28] sm:$0xff] %v1085_v60 }
 0x330   : > { %1089 = vst [vmem:[%s201_s28 + $0x8] sm:$0xff] %v1086_v62 }
 0x331   : > { %1090 = vst [vmem:[%s201_s28 + $0x10] sm:$0xff] %v1087_v3 }
 0x332   : > { %1479 = shalt.err (!%p1476_p7)
}
 0x333   : > { %s1480_s30 = scalar_lea.hbm %s2140_s6, 384  ;;  %s1484_s5 = scalar_lea.hbm %s2187_s3, 768 }
 0x334   : > { %p1481_p9 = scmp.ne.s32.totalorder %s2140_s6, %s1480_s30  ;;  %p1485_p0 = scmp.lt.u32.totalorder %s2140_s6, %s2187_s3 }
 0x335   : > { %p1486_p11 = scmp.lt.u32.totalorder %s1484_s5, %s1480_s30  ;;  %p1488_p4 = scmp.lt.u32.totalorder %s1480_s30, %s2140_s6 }
 0x336   : > { %p1482_p2 = pnand %p1481_p9, %p1679_p12 }
 0x337   : > { %p1487_p1 = por %p1486_p11, %p1485_p0 }
 0x338   : > { %p1483_p5 = pneg %p1482_p2 }
 0x339   : > { %p1489_p6 = por %p1488_p4, %p1487_p1 }
 0x33b   : > { %p1490_p8 = pnand %p1489_p6, %p1483_p5 }
 0x33d   : > { %1493 = shalt.err (!%p1490_p8)
}
 0x33e   : > { %1310 = dma.vmem_to_hbm [thread:$0]  (%p1679_p12), %s2142_s29, 384, %s2140_s6, %s1092_s16  }
 0x33f PF: > { %s1118_s10 = sand.u32 1, %s1524_s12   ;;  %p2202_p10 = scmp.ne.s32.totalorder %s2192_s19, 0 }
 0x340   : > { %p2203_p13 = scmp.ge.s32.totalorder %s1536_s15, 2  ;;  %s1119_s11 = scalar_lea.sflag [#allocation5], %s1118_s10 }
 0x342   : > { %p1321_p3 = pnand %p2203_p13, %p2202_p10 }
 0x344   : > { %1519 = dma.done.wait (!%p1321_p3), %s1119_s11, 384  }
 0x345   : > { %1521 = vsyncadd (!%p1321_p3), %s1119_s11, 4294966912  ;;  %p17_p7 = scmp.ge.s32.totalorder %s1644_s24, 4   ;;  %s2204_s12 = smov %s1528_s13 }
 0x346   : > { %s2205_s13 = smov %s1532_s14  ;;  %s2206_s14 = smov %s1675_s17 }
 0x347   : > { %s2207_s15 = smov %s1644_s24  ;;  %19 = sbr.rel (!%p17_p7) target bundleno = 6 (0x6), region = 81 }
 0x34e   :  { %1124 = vsyncpa [#allocation4], 1 }
 0x34f   :  { %1126 = vsyncpa [#allocation4 + $0x1], 1 }
 0x350   :  { %1127 = vsyncpa [#allocation7], 1 }
 0x351   :  { %1128 = vsyncpa [#allocation5], 1 }
 0x352   :  { %1130 = vsyncpa [#allocation5 + $0x1], 1 }

</bundles_post_ra>
